<compile_context>
chip_gen: v5e
topology: v5e:2x2
jax: 0.10.0
libtpu: 0.0.40
codegen_flags: <defaults>
</compile_context>

<pallas_src>
import jax
import jax.numpy as jnp
import numpy as np
from jax.experimental import pallas as pl
from jax.experimental.pallas import tpu as pltpu

NUM_GROUPS = 32
EPS = 1e-5  # PyTorch GroupNorm default


# ------------------------------ kernel ------------------------------

def _fsm_kernel(x_ref, w1_ref, pc1_ref, w2_ref, pc2_ref,
                gm1_ref, gm1t_ref, gm2_ref, gm2t_ref, inv_hw_ref,
                o_ref):
    """One batch element per grid step.

    x_ref    : (1, Cin, HW)  activations (f32 or bf16), HW on the lane axis
    w1_ref   : (Cin, Cin)    conv_atten weight, native [out, in] layout (f32)
    pc1_ref  : (Cin, 3)      packed [bias1, gamma1, beta1] columns
    w2_ref   : (Cout, Cin)   conv weight, native [out, in] layout (bf16 fast path)
    pc2_ref  : (Cout, 3)     packed [bias2, gamma2, beta2] columns
    gm*_ref  : (C, 32)       one-hot group membership
    gm*t_ref : (32, C)       transposed membership, prescaled by 1/channels_per_group
    inv_hw   : (HW, 1)       resident constant column of 1/HW
    o_ref    : (1, Cout, HW) output (bf16 by default)
    """
    x = x_ref[0]                                         # (Cin, HW)
    inv_hw = inv_hw_ref[...]                             # (HW, 1) resident constant

    # ---- F.avg_pool2d(x, (H, W)): spatial mean as a single MXU dot ----
    avg = jnp.dot(x, inv_hw, preferred_element_type=jnp.float32)            # (Cin, 1) f32

    # ---- conv_atten: 1x1 conv == W1 @ avg (+ bias), weights in [out, in] layout ----
    pc1 = pc1_ref[...]                                   # (Cin, 3) = [bias, gamma, beta]
    a = jnp.dot(w1_ref[...], avg, preferred_element_type=jnp.float32) + pc1[:, 0:1]

    # ---- GroupNorm(32, Cin) on the (Cin, 1) column; merged moment dots ----
    st1 = jnp.concatenate([a, a * a], axis=1)                                # (Cin, 2)
    g1 = jnp.dot(gm1t_ref[...], st1, preferred_element_type=jnp.float32)     # (32, 2)
    gmean = g1[:, 0:1]
    gvar = jnp.maximum(g1[:, 1:2] - gmean * gmean, 0.0)                      # clamp >= 0
    back1 = jnp.dot(gm1_ref[...], jnp.concatenate([gmean, gvar], axis=1),
                    preferred_element_type=jnp.float32)                      # (Cin, 2)
    s1 = pc1[:, 1:2] * jax.lax.rsqrt(back1[:, 1:2] + EPS)                    # folded affine
    t1 = pc1[:, 2:3] - back1[:, 0:1] * s1
    atten = jax.nn.sigmoid(a * s1 + t1)                                      # (Cin, 1) f32

    # ---- x + x*atten == x*(1+atten); gate directly in the matmul compute dtype ----
    cd = w2_ref.dtype
    xs = x.astype(cd) * (1.0 + atten).astype(cd)                             # (Cin, HW) cd

    # ---- conv: 1x1 Cin -> Cout, compute-dtype operands, f32 accumulation ----
    pc2 = pc2_ref[...]
    y = jnp.dot(w2_ref[...], xs, preferred_element_type=jnp.float32) + pc2[:, 0:1]  # (Cout, HW)

    # ---- GroupNorm(32, Cout): HW moments via MXU dots, merged group dots ----
    # (If a bundle profile shows the MXU-push slot saturating at large C, stack
    #  [y; y*y] into one dot or switch these to XLU row reductions.)
    csum = jnp.dot(y, inv_hw, preferred_element_type=jnp.float32)            # (Cout, 1) E_hw[y]
    csq = jnp.dot(y * y, inv_hw, preferred_element_type=jnp.float32)         # (Cout, 1) E_hw[y^2]
    g2 = jnp.dot(gm2t_ref[...], jnp.concatenate([csum, csq], axis=1),
                 preferred_element_type=jnp.float32)                         # (32, 2)
    m2 = g2[:, 0:1]
    v2 = jnp.maximum(g2[:, 1:2] - m2 * m2, 0.0)
    back2 = jnp.dot(gm2_ref[...], jnp.concatenate([m2, v2], axis=1),
                    preferred_element_type=jnp.float32)                      # (Cout, 2)
    s2 = pc2[:, 1:2] * jax.lax.rsqrt(back2[:, 1:2] + EPS)
    t2 = pc2[:, 2:3] - back2[:, 0:1] * s2
    o_ref[0] = (y * s2 + t2).astype(o_ref.dtype)                             # 2 VPU ops/elem epilogue


# ------------------------------ VMEM accounting ------------------------------

def _vmem_padded_bytes(shape, dtype):
    """Bytes a VMEM-resident array occupies after (sublane, lane) padding."""
    itemsize = np.dtype(dtype).itemsize
    sub_tile = 8 * max(1, 4 // itemsize)           # 8 rows (f32), 16 (bf16), 32 (i8)
    lane = -(-int(shape[-1]) // 128) * 128
    sub = -(-int(shape[-2]) // sub_tile) * sub_tile
    lead = 1
    for d in shape[:-2]:
        lead *= int(d)
    return lead * sub * lane * itemsize


def _vmem_limit_bytes(Cin, Cout, HW, x_dtype, compute_dtype, out_dtype, single_buffer_params):
    f32 = jnp.float32
    # double-buffered activation / output blocks
    act = 2 * (_vmem_padded_bytes((1, Cin, HW), x_dtype)
               + _vmem_padded_bytes((1, Cout, HW), out_dtype))
    # constant operands (lane-padded), single- or double-buffered
    nb = 1 if single_buffer_params else 2
    const = nb * (
        _vmem_padded_bytes((Cin, Cin), f32)
        + _vmem_padded_bytes((Cin, 3), f32)
        + _vmem_padded_bytes((Cout, Cin), compute_dtype)
        + _vmem_padded_bytes((Cout, 3), f32)
        + _vmem_padded_bytes((Cin, NUM_GROUPS), f32)
        + _vmem_padded_bytes((NUM_GROUPS, Cin), f32)
        + _vmem_padded_bytes((Cout, NUM_GROUPS), f32)
        + _vmem_padded_bytes((NUM_GROUPS, Cout), f32)
        + _vmem_padded_bytes((HW, 1), x_dtype))
    # in-kernel temporaries: xs (compute dtype), y and y*y (f32); small columns ignored
    tmp = (_vmem_padded_bytes((Cin, HW), compute_dtype)
           + 2 * _vmem_padded_bytes((Cout, HW), f32))
    need = int(1.25 * (act + const + tmp)) + (2 << 20)

    try:
        info = pltpu.get_tpu_info()
        phys = int(getattr(info, "vmem_capacity_bytes", 64 * 1024 * 1024))
    except Exception:
        phys = 64 * 1024 * 1024                     # conservative (v7x per-TC size)
    cap = (phys * 3) // 4                           # headroom for Mosaic internal scratch
    # TODO(synk): if need > cap (large C*HW on v7x), use the HW-tiled two-pass variant
    # instead of clamping.
    return max(min(need, cap), min(16 * 1024 * 1024, cap))


# ------------------------------ pallas_call builder ------------------------------

def _build_fsm_call(B, Cin, Cout, HW, x_dtype, compute_dtype, out_dtype, *,
                    single_buffer_params):
    # Constant operands: block index never changes across the batch grid, so a single
    # VMEM buffer suffices (halves the constant VMEM footprint).
    const_kwargs = dict(pipeline_mode=pl.Buffered(1)) if single_buffer_params else {}

    def const_spec(shape):
        zeros = (0,) * len(shape)
        return pl.BlockSpec(shape, lambda b, _z=zeros: _z, **const_kwargs)

    vmem_limit = _vmem_limit_bytes(Cin, Cout, HW, x_dtype, compute_dtype, out_dtype,
                                   single_buffer_params)

    return pl.pallas_call(
        _fsm_kernel,
        out_shape=jax.ShapeDtypeStruct((B, Cout, HW), out_dtype),
        grid_spec=pltpu.PrefetchScalarGridSpec(
            num_scalar_prefetch=0,
            grid=(B,),
            in_specs=[
                pl.BlockSpec((1, Cin, HW), lambda b: (b, 0, 0)),   # x: lane-dense HW
                const_spec((Cin, Cin)),                            # w1
                const_spec((Cin, 3)),                              # packed [b1, gamma1, beta1]
                const_spec((Cout, Cin)),                           # w2 (compute dtype)
                const_spec((Cout, 3)),                             # packed [b2, gamma2, beta2]
                const_spec((Cin, NUM_GROUPS)),                     # gm1
                const_spec((NUM_GROUPS, Cin)),                     # gm1t (prescaled)
                const_spec((Cout, NUM_GROUPS)),                    # gm2
                const_spec((NUM_GROUPS, Cout)),                    # gm2t (prescaled)
                const_spec((HW, 1)),                               # inv_hw column
            ],
            out_specs=pl.BlockSpec((1, Cout, HW), lambda b: (b, 0, 0)),
        ),
        compiler_params=pltpu.CompilerParams(
            dimension_semantics=("parallel",),        # megacore: shard batch across TCs
            vmem_limit_bytes=vmem_limit,
        ),
    )


def feature_selection_module(x_nchw, params, *,
                             compute_dtype=jnp.bfloat16,
                             out_dtype=jnp.bfloat16):
    """x_nchw: (B, Cin, H, W), f32 or bf16.  Returns (B, Cout, H, W) in out_dtype.

    compute_dtype controls the operand dtype of the dominant (Cout,Cin)@(Cin,HW)
    matmul (bf16 fast path / f32 exact path); accumulation is always f32.
    out_dtype is the HBM output dtype (bf16 by default: the kernel is mem-bound,
    so narrowing the interface is the largest win). No wrapper-side casts.
    """
    B, Cin, H, W = x_nchw.shape
    HW = H * W
    Cout = params["w2"].shape[0]

    # NCHW -> (B, C, HW): a free reshape, NO transpose. HW lands on the lane axis.
    x = x_nchw.reshape(B, Cin, HW)
    w2 = params["w2"].astype(compute_dtype)
    # Pack per-channel columns: 6 lane-padded (C,1) operands become 2 (C,3) operands.
    pc1 = jnp.concatenate([params["b1"], params["gamma1"], params["beta1"]], axis=1)
    pc2 = jnp.concatenate([params["b2"], params["gamma2"], params["beta2"]], axis=1)
    # Resident 1/HW column (matches x dtype so no in-kernel promotion of x).
    inv_hw = jnp.full((HW, 1), 1.0 / HW, dtype=x.dtype)

    args = (x, params["w1"], pc1, w2, pc2,
            params["gm1"], params["gm1t"], params["gm2"], params["gm2t"], inv_hw)

    use_single = hasattr(pl, "Buffered")
    if use_single:
        try:
            out = _build_fsm_call(B, Cin, Cout, HW, x.dtype, compute_dtype, out_dtype,
                                  single_buffer_params=True)(*args)
        except (TypeError, ValueError, NotImplementedError, pltpu.LoweringException):
            # Only a pipeline_mode=pl.Buffered(1) rejection lands here; runtime
            # failures (e.g. VMEM OOM at execution) propagate to the caller.
            out = _build_fsm_call(B, Cin, Cout, HW, x.dtype, compute_dtype, out_dtype,
                                  single_buffer_params=False)(*args)
    else:
        out = _build_fsm_call(B, Cin, Cout, HW, x.dtype, compute_dtype, out_dtype,
                              single_buffer_params=False)(*args)

    # (B, Cout, HW) -> NCHW: again a free reshape, no transpose, no dtype cast.
    return out.reshape(B, Cout, H, W)


# ------------------------- parameter construction -------------------------

def make_params(key, in_chan, out_chan):
    assert in_chan % NUM_GROUPS == 0 and out_chan % NUM_GROUPS == 0
    k1, k2, k3, k4 = jax.random.split(key, 4)

    # xavier_uniform for 1x1 convs: bound = sqrt(6 / (fan_in + fan_out)); native [out, in]
    bnd1 = float(np.sqrt(6.0 / (in_chan + in_chan)))
    w1 = jax.random.uniform(k1, (in_chan, in_chan), jnp.float32, -bnd1, bnd1)
    bnd2 = float(np.sqrt(6.0 / (in_chan + out_chan)))
    w2 = jax.random.uniform(k2, (out_chan, in_chan), jnp.float32, -bnd2, bnd2)

    # PyTorch default conv bias init: U(-1/sqrt(fan_in), 1/sqrt(fan_in)); stored as (C, 1)
    bb = 1.0 / float(np.sqrt(in_chan))
    b1 = jax.random.uniform(k3, (in_chan, 1), jnp.float32, -bb, bb)
    b2 = jax.random.uniform(k4, (out_chan, 1), jnp.float32, -bb, bb)

    gamma1 = jnp.ones((in_chan, 1), jnp.float32)
    beta1 = jnp.zeros((in_chan, 1), jnp.float32)
    gamma2 = jnp.ones((out_chan, 1), jnp.float32)
    beta2 = jnp.zeros((out_chan, 1), jnp.float32)

    # one-hot group membership (contiguous channel groups); transpose prescaled by 1/cpg
    def group_mats(c):
        cpg = c // NUM_GROUPS
        g = np.arange(c) // cpg
        m = np.zeros((c, NUM_GROUPS), np.float32)
        m[np.arange(c), g] = 1.0
        return jnp.asarray(m), jnp.asarray(m.T / cpg)

    gm1, gm1t = group_mats(in_chan)
    gm2, gm2t = group_mats(out_chan)

    return {
        "w1": w1, "b1": b1, "gamma1": gamma1, "beta1": beta1,
        "w2": w2, "b2": b2, "gamma2": gamma2, "beta2": beta2,
        "gm1": gm1, "gm1t": gm1t, "gm2": gm2, "gm2t": gm2t,
    }


# ------------------------- pure-JAX reference (PyTorch-faithful) -------------------------

def reference(x_nchw, params):
    B, Cin, H, W = x_nchw.shape
    Cout = params["w2"].shape[0]

    def group_norm(v, gamma, beta):
        b, c, h, w = v.shape
        vg = v.reshape(b, NUM_GROUPS, -1)
        mean = jnp.mean(vg, axis=-1, keepdims=True)
        var = jnp.mean((vg - mean) ** 2, axis=-1, keepdims=True)
        vn = ((vg - mean) / jnp.sqrt(var + EPS)).reshape(b, c, h, w)
        return vn * gamma.reshape(1, c, 1, 1) + beta.reshape(1, c, 1, 1)

    avg = jnp.mean(x_nchw, axis=(2, 3), keepdims=True)                           # (B, Cin, 1, 1)
    a = jnp.einsum("oc,bchw->bohw", params["w1"], avg) + params["b1"].reshape(1, Cin, 1, 1)
    atten = jax.nn.sigmoid(group_norm(a, params["gamma1"], params["beta1"]))
    x2 = x_nchw + x_nchw * atten
    y = jnp.einsum("oc,bchw->bohw", params["w2"], x2) + params["b2"].reshape(1, Cout, 1, 1)
    return group_norm(y, params["gamma2"], params["beta2"])


if __name__ == "__main__":
    # GroupNorm(32, C) requires C % 32 == 0; HW = 256 keeps loads/stores lane-dense.
    B, Cin, Cout, H, W = 2, 64, 32, 16, 16

    key = jax.random.PRNGKey(0)
    kx, kp = jax.random.split(key)
    x = jax.random.normal(kx, (B, Cin, H, W), jnp.float32)
    params = make_params(kp, Cin, Cout)

    ref = jax.block_until_ready(reference(x, params))

    # exactness check: f32 operands on the main matmul, f32 output
    out_f32 = jax.block_until_ready(
        feature_selection_module(x, params, compute_dtype=jnp.float32,
                                 out_dtype=jnp.float32))
    assert out_f32.shape == (B, Cout, H, W)
    np.testing.assert_allclose(np.asarray(out_f32), np.asarray(ref), rtol=1e-4, atol=1e-4)

    # fast path: bf16 matmul operands, f32 accumulation, bf16 HBM output
    out_fast = jax.block_until_ready(feature_selection_module(x, params))
    assert out_fast.shape == (B, Cout, H, W)
    assert out_fast.dtype == jnp.bfloat16
    np.testing.assert_allclose(np.asarray(out_fast.astype(jnp.float32)),
                               np.asarray(ref), rtol=4e-2, atol=4e-2)

    # narrow HBM read as well: bf16 activations consumed directly (no wrapper cast)
    out_bf16_in = jax.block_until_ready(
        feature_selection_module(x.astype(jnp.bfloat16), params))
    assert out_bf16_in.shape == (B, Cout, H, W)
    assert bool(jnp.all(jnp.isfinite(out_bf16_in.astype(jnp.float32))))

    print("KERNEL_OK")
</pallas_src>

<mosaic_0001>
module attributes {stable_mosaic.version = 11 : i64} {
  func.func @_fsm_kernel(%arg0: i32, %arg1: memref<1x64x256xf32, #tpu.memory_space<vmem>>, %arg2: memref<64x64xf32, #tpu.memory_space<vmem>>, %arg3: memref<64x3xf32, #tpu.memory_space<vmem>>, %arg4: memref<32x64xf32, #tpu.memory_space<vmem>>, %arg5: memref<32x3xf32, #tpu.memory_space<vmem>>, %arg6: memref<64x32xf32, #tpu.memory_space<vmem>>, %arg7: memref<32x64xf32, #tpu.memory_space<vmem>>, %arg8: memref<32x32xf32, #tpu.memory_space<vmem>>, %arg9: memref<32x32xf32, #tpu.memory_space<vmem>>, %arg10: memref<256x1xf32, #tpu.memory_space<vmem>>, %arg11: memref<1x32x256xf32, #tpu.memory_space<vmem>>) attributes {dimension_semantics = [#tpu.dimension_semantics<parallel>], iteration_bounds = array<i64: 2>, scalar_prefetch = 0 : i64, scratch_operands = 0 : i64, tpu.core_type = #tpu.core_type<tc>, window_params = [{transform_indices = @transform_0, window_bounds = array<i64: 1, 64, 256>}, {pipeline_mode = #tpu.pipeline_mode<synchronous>, transform_indices = @transform_1, window_bounds = array<i64: 64, 64>}, {pipeline_mode = #tpu.pipeline_mode<synchronous>, transform_indices = @transform_2, window_bounds = array<i64: 64, 3>}, {pipeline_mode = #tpu.pipeline_mode<synchronous>, transform_indices = @transform_3, window_bounds = array<i64: 32, 64>}, {pipeline_mode = #tpu.pipeline_mode<synchronous>, transform_indices = @transform_4, window_bounds = array<i64: 32, 3>}, {pipeline_mode = #tpu.pipeline_mode<synchronous>, transform_indices = @transform_5, window_bounds = array<i64: 64, 32>}, {pipeline_mode = #tpu.pipeline_mode<synchronous>, transform_indices = @transform_6, window_bounds = array<i64: 32, 64>}, {pipeline_mode = #tpu.pipeline_mode<synchronous>, transform_indices = @transform_7, window_bounds = array<i64: 32, 32>}, {pipeline_mode = #tpu.pipeline_mode<synchronous>, transform_indices = @transform_8, window_bounds = array<i64: 32, 32>}, {pipeline_mode = #tpu.pipeline_mode<synchronous>, transform_indices = @transform_9, window_bounds = array<i64: 256, 1>}, {transform_indices = @transform_10, window_bounds = array<i64: 1, 32, 256>}]} {
    %c0 = arith.constant 0 : index
    %c0_0 = arith.constant 0 : index
    %c0_1 = arith.constant 0 : index
    %0 = vector.load %arg1[%c0, %c0_0, %c0_1] : memref<1x64x256xf32, #tpu.memory_space<vmem>>, vector<1x64x256xf32>
    %1 = vector.shape_cast %0 : vector<1x64x256xf32> to vector<64x256xf32>
    %c0_2 = arith.constant 0 : index
    %c0_3 = arith.constant 0 : index
    %2 = vector.load %arg10[%c0_2, %c0_3] : memref<256x1xf32, #tpu.memory_space<vmem>>, vector<256x1xf32>
    %cst = arith.constant dense<0.000000e+00> : vector<64x1xf32>
    %3 = tpu.matmul %1, %2, %cst {dimension_numbers = #tpu.dot_dimension_numbers<[1], [0], [0], [1], [0, 0, 1, 1], [], []>} : vector<64x256xf32>, vector<256x1xf32>, vector<64x1xf32> -> vector<64x1xf32>
    %c0_4 = arith.constant 0 : index
    %c0_5 = arith.constant 0 : index
    %4 = vector.load %arg3[%c0_4, %c0_5] : memref<64x3xf32, #tpu.memory_space<vmem>>, vector<64x3xf32>
    %c0_6 = arith.constant 0 : index
    %c0_7 = arith.constant 0 : index
    %5 = vector.load %arg2[%c0_6, %c0_7] : memref<64x64xf32, #tpu.memory_space<vmem>>, vector<64x64xf32>
    %cst_8 = arith.constant dense<0.000000e+00> : vector<64x1xf32>
    %6 = tpu.matmul %5, %3, %cst_8 {dimension_numbers = #tpu.dot_dimension_numbers<[1], [0], [0], [1], [0, 0, 1, 1], [], []>} : vector<64x64xf32>, vector<64x1xf32>, vector<64x1xf32> -> vector<64x1xf32>
    %7 = vector.extract_strided_slice %4 {offsets = [0, 0], sizes = [64, 1], strides = [1, 1]} : vector<64x3xf32> to vector<64x1xf32>
    %8 = arith.addf %6, %7 : vector<64x1xf32>
    %9 = arith.mulf %8, %8 : vector<64x1xf32>
    %10 = tpu.concatenate %8, %9 in 1 : vector<64x1xf32>, vector<64x1xf32> -> vector<64x2xf32>
    %c0_9 = arith.constant 0 : index
    %c0_10 = arith.constant 0 : index
    %11 = vector.load %arg7[%c0_9, %c0_10] : memref<32x64xf32, #tpu.memory_space<vmem>>, vector<32x64xf32>
    %cst_11 = arith.constant dense<0.000000e+00> : vector<32x2xf32>
    %12 = tpu.matmul %11, %10, %cst_11 {dimension_numbers = #tpu.dot_dimension_numbers<[1], [0], [0], [1], [0, 0, 1, 1], [], []>} : vector<32x64xf32>, vector<64x2xf32>, vector<32x2xf32> -> vector<32x2xf32>
    %13 = vector.extract_strided_slice %12 {offsets = [0, 0], sizes = [32, 1], strides = [1, 1]} : vector<32x2xf32> to vector<32x1xf32>
    %14 = vector.extract_strided_slice %12 {offsets = [0, 1], sizes = [32, 1], strides = [1, 1]} : vector<32x2xf32> to vector<32x1xf32>
    %15 = arith.mulf %13, %13 : vector<32x1xf32>
    %16 = arith.subf %14, %15 : vector<32x1xf32>
    %cst_12 = arith.constant 0.000000e+00 : f32
    %17 = vector.broadcast %cst_12 : f32 to vector<32x1xf32>
    %18 = arith.maximumf %16, %17 : vector<32x1xf32>
    %c0_13 = arith.constant 0 : index
    %c0_14 = arith.constant 0 : index
    %19 = vector.load %arg6[%c0_13, %c0_14] : memref<64x32xf32, #tpu.memory_space<vmem>>, vector<64x32xf32>
    %20 = tpu.concatenate %13, %18 in 1 : vector<32x1xf32>, vector<32x1xf32> -> vector<32x2xf32>
    %cst_15 = arith.constant dense<0.000000e+00> : vector<64x2xf32>
    %21 = tpu.matmul %19, %20, %cst_15 {dimension_numbers = #tpu.dot_dimension_numbers<[1], [0], [0], [1], [0, 0, 1, 1], [], []>} : vector<64x32xf32>, vector<32x2xf32>, vector<64x2xf32> -> vector<64x2xf32>
    %22 = vector.extract_strided_slice %4 {offsets = [0, 1], sizes = [64, 1], strides = [1, 1]} : vector<64x3xf32> to vector<64x1xf32>
    %23 = vector.extract_strided_slice %21 {offsets = [0, 1], sizes = [64, 1], strides = [1, 1]} : vector<64x2xf32> to vector<64x1xf32>
    %cst_16 = arith.constant 9.99999974E-6 : f32
    %24 = vector.broadcast %cst_16 : f32 to vector<64x1xf32>
    %25 = arith.addf %23, %24 : vector<64x1xf32>
    %26 = math.rsqrt %25 : vector<64x1xf32>
    %27 = arith.mulf %22, %26 : vector<64x1xf32>
    %28 = vector.extract_strided_slice %4 {offsets = [0, 2], sizes = [64, 1], strides = [1, 1]} : vector<64x3xf32> to vector<64x1xf32>
    %29 = vector.extract_strided_slice %21 {offsets = [0, 0], sizes = [64, 1], strides = [1, 1]} : vector<64x2xf32> to vector<64x1xf32>
    %30 = arith.mulf %29, %27 : vector<64x1xf32>
    %31 = arith.subf %28, %30 : vector<64x1xf32>
    %32 = arith.mulf %8, %27 : vector<64x1xf32>
    %33 = arith.addf %32, %31 : vector<64x1xf32>
    %34 = arith.negf %33 : vector<64x1xf32>
    %35 = math.exp %34 : vector<64x1xf32>
    %cst_17 = arith.constant 1.000000e+00 : f32
    %36 = vector.broadcast %cst_17 : f32 to vector<64x1xf32>
    %37 = arith.addf %36, %35 : vector<64x1xf32>
    %38 = arith.divf %36, %37 : vector<64x1xf32>
    %cst_18 = arith.constant 1.000000e+00 : f32
    %39 = vector.broadcast %cst_18 : f32 to vector<64x1xf32>
    %40 = arith.addf %39, %38 : vector<64x1xf32>
    %41 = vector.broadcast %40 : vector<64x1xf32> to vector<64x256xf32>
    %42 = arith.mulf %1, %41 : vector<64x256xf32>
    %c0_19 = arith.constant 0 : index
    %c0_20 = arith.constant 0 : index
    %43 = vector.load %arg5[%c0_19, %c0_20] : memref<32x3xf32, #tpu.memory_space<vmem>>, vector<32x3xf32>
    %c0_21 = arith.constant 0 : index
    %c0_22 = arith.constant 0 : index
    %44 = vector.load %arg4[%c0_21, %c0_22] : memref<32x64xf32, #tpu.memory_space<vmem>>, vector<32x64xf32>
    %cst_23 = arith.constant dense<0.000000e+00> : vector<32x256xf32>
    %45 = tpu.matmul %44, %42, %cst_23 {dimension_numbers = #tpu.dot_dimension_numbers<[1], [0], [0], [1], [0, 0, 1, 1], [], []>} : vector<32x64xf32>, vector<64x256xf32>, vector<32x256xf32> -> vector<32x256xf32>
    %46 = vector.extract_strided_slice %43 {offsets = [0, 0], sizes = [32, 1], strides = [1, 1]} : vector<32x3xf32> to vector<32x1xf32>
    %47 = vector.broadcast %46 : vector<32x1xf32> to vector<32x256xf32>
    %48 = arith.addf %45, %47 : vector<32x256xf32>
    %cst_24 = arith.constant dense<0.000000e+00> : vector<32x1xf32>
    %49 = tpu.matmul %48, %2, %cst_24 {dimension_numbers = #tpu.dot_dimension_numbers<[1], [0], [0], [1], [0, 0, 1, 1], [], []>} : vector<32x256xf32>, vector<256x1xf32>, vector<32x1xf32> -> vector<32x1xf32>
    %50 = arith.mulf %48, %48 : vector<32x256xf32>
    %cst_25 = arith.constant dense<0.000000e+00> : vector<32x1xf32>
    %51 = tpu.matmul %50, %2, %cst_25 {dimension_numbers = #tpu.dot_dimension_numbers<[1], [0], [0], [1], [0, 0, 1, 1], [], []>} : vector<32x256xf32>, vector<256x1xf32>, vector<32x1xf32> -> vector<32x1xf32>
    %c0_26 = arith.constant 0 : index
    %c0_27 = arith.constant 0 : index
    %52 = vector.load %arg9[%c0_26, %c0_27] : memref<32x32xf32, #tpu.memory_space<vmem>>, vector<32x32xf32>
    %53 = tpu.concatenate %49, %51 in 1 : vector<32x1xf32>, vector<32x1xf32> -> vector<32x2xf32>
    %cst_28 = arith.constant dense<0.000000e+00> : vector<32x2xf32>
    %54 = tpu.matmul %52, %53, %cst_28 {dimension_numbers = #tpu.dot_dimension_numbers<[1], [0], [0], [1], [0, 0, 1, 1], [], []>} : vector<32x32xf32>, vector<32x2xf32>, vector<32x2xf32> -> vector<32x2xf32>
    %55 = vector.extract_strided_slice %54 {offsets = [0, 0], sizes = [32, 1], strides = [1, 1]} : vector<32x2xf32> to vector<32x1xf32>
    %56 = vector.extract_strided_slice %54 {offsets = [0, 1], sizes = [32, 1], strides = [1, 1]} : vector<32x2xf32> to vector<32x1xf32>
    %57 = arith.mulf %55, %55 : vector<32x1xf32>
    %58 = arith.subf %56, %57 : vector<32x1xf32>
    %cst_29 = arith.constant 0.000000e+00 : f32
    %59 = vector.broadcast %cst_29 : f32 to vector<32x1xf32>
    %60 = arith.maximumf %58, %59 : vector<32x1xf32>
    %c0_30 = arith.constant 0 : index
    %c0_31 = arith.constant 0 : index
    %61 = vector.load %arg8[%c0_30, %c0_31] : memref<32x32xf32, #tpu.memory_space<vmem>>, vector<32x32xf32>
    %62 = tpu.concatenate %55, %60 in 1 : vector<32x1xf32>, vector<32x1xf32> -> vector<32x2xf32>
    %cst_32 = arith.constant dense<0.000000e+00> : vector<32x2xf32>
    %63 = tpu.matmul %61, %62, %cst_32 {dimension_numbers = #tpu.dot_dimension_numbers<[1], [0], [0], [1], [0, 0, 1, 1], [], []>} : vector<32x32xf32>, vector<32x2xf32>, vector<32x2xf32> -> vector<32x2xf32>
    %64 = vector.extract_strided_slice %43 {offsets = [0, 1], sizes = [32, 1], strides = [1, 1]} : vector<32x3xf32> to vector<32x1xf32>
    %65 = vector.extract_strided_slice %63 {offsets = [0, 1], sizes = [32, 1], strides = [1, 1]} : vector<32x2xf32> to vector<32x1xf32>
    %cst_33 = arith.constant 9.99999974E-6 : f32
    %66 = vector.broadcast %cst_33 : f32 to vector<32x1xf32>
    %67 = arith.addf %65, %66 : vector<32x1xf32>
    %68 = math.rsqrt %67 : vector<32x1xf32>
    %69 = arith.mulf %64, %68 : vector<32x1xf32>
    %70 = vector.extract_strided_slice %43 {offsets = [0, 2], sizes = [32, 1], strides = [1, 1]} : vector<32x3xf32> to vector<32x1xf32>
    %71 = vector.extract_strided_slice %63 {offsets = [0, 0], sizes = [32, 1], strides = [1, 1]} : vector<32x2xf32> to vector<32x1xf32>
    %72 = arith.mulf %71, %69 : vector<32x1xf32>
    %73 = arith.subf %70, %72 : vector<32x1xf32>
    %74 = vector.broadcast %69 : vector<32x1xf32> to vector<32x256xf32>
    %75 = arith.mulf %48, %74 : vector<32x256xf32>
    %76 = vector.broadcast %73 : vector<32x1xf32> to vector<32x256xf32>
    %77 = arith.addf %75, %76 : vector<32x256xf32>
    %c0_34 = arith.constant 0 : index
    %c0_35 = arith.constant 0 : index
    %c0_36 = arith.constant 0 : index
    %78 = vector.load %arg11[%c0_34, %c0_35, %c0_36] : memref<1x32x256xf32, #tpu.memory_space<vmem>>, vector<1x32x256xf32>
    %79 = vector.shape_cast %78 : vector<1x32x256xf32> to vector<32x256xf32>
    %80 = vector.shape_cast %77 : vector<32x256xf32> to vector<1x32x256xf32>
    tpu.vector_store %arg11[%c0_34, %c0_35, %c0_36], %80 {strides = array<i32>} : memref<1x32x256xf32, #tpu.memory_space<vmem>>, vector<1x32x256xf32>,
    return
  }
  func.func @transform_0(%arg0: i32) -> (i32, i32, i32) {
    %c0_i32 = arith.constant 0 : i32
    %c0_i32_0 = arith.constant 0 : i32
    %c0_i32_1 = arith.constant 0 : i32
    return %arg0, %c0_i32, %c0_i32_0 : i32, i32, i32
  }
  func.func @transform_1(%arg0: i32) -> (i32, i32) {
    %c0_i32 = arith.constant 0 : i32
    %c0_i32_0 = arith.constant 0 : i32
    %c0_i32_1 = arith.constant 0 : i32
    return %c0_i32, %c0_i32_0 : i32, i32
  }
  func.func @transform_2(%arg0: i32) -> (i32, i32) {
    %c0_i32 = arith.constant 0 : i32
    %c0_i32_0 = arith.constant 0 : i32
    %c0_i32_1 = arith.constant 0 : i32
    return %c0_i32, %c0_i32_0 : i32, i32
  }
  func.func @transform_3(%arg0: i32) -> (i32, i32) {
    %c0_i32 = arith.constant 0 : i32
    %c0_i32_0 = arith.constant 0 : i32
    %c0_i32_1 = arith.constant 0 : i32
    return %c0_i32, %c0_i32_0 : i32, i32
  }
  func.func @transform_4(%arg0: i32) -> (i32, i32) {
    %c0_i32 = arith.constant 0 : i32
    %c0_i32_0 = arith.constant 0 : i32
    %c0_i32_1 = arith.constant 0 : i32
    return %c0_i32, %c0_i32_0 : i32, i32
  }
  func.func @transform_5(%arg0: i32) -> (i32, i32) {
    %c0_i32 = arith.constant 0 : i32
    %c0_i32_0 = arith.constant 0 : i32
    %c0_i32_1 = arith.constant 0 : i32
    return %c0_i32, %c0_i32_0 : i32, i32
  }
  func.func @transform_6(%arg0: i32) -> (i32, i32) {
    %c0_i32 = arith.constant 0 : i32
    %c0_i32_0 = arith.constant 0 : i32
    %c0_i32_1 = arith.constant 0 : i32
    return %c0_i32, %c0_i32_0 : i32, i32
  }
  func.func @transform_7(%arg0: i32) -> (i32, i32) {
    %c0_i32 = arith.constant 0 : i32
    %c0_i32_0 = arith.constant 0 : i32
    %c0_i32_1 = arith.constant 0 : i32
    return %c0_i32, %c0_i32_0 : i32, i32
  }
  func.func @transform_8(%arg0: i32) -> (i32, i32) {
    %c0_i32 = arith.constant 0 : i32
    %c0_i32_0 = arith.constant 0 : i32
    %c0_i32_1 = arith.constant 0 : i32
    return %c0_i32, %c0_i32_0 : i32, i32
  }
  func.func @transform_9(%arg0: i32) -> (i32, i32) {
    %c0_i32 = arith.constant 0 : i32
    %c0_i32_0 = arith.constant 0 : i32
    %c0_i32_1 = arith.constant 0 : i32
    return %c0_i32, %c0_i32_0 : i32, i32
  }
  func.func @transform_10(%arg0: i32) -> (i32, i32, i32) {
    %c0_i32 = arith.constant 0 : i32
    %c0_i32_0 = arith.constant 0 : i32
    %c0_i32_1 = arith.constant 0 : i32
    return %arg0, %c0_i32, %c0_i32_0 : i32, i32, i32
  }
}

</mosaic_0001>

<bundles_post_ra>
// kernel: tpu_custom_call.1
= control target key start
LH: loop header
LB: loop body
LE: loop exit
PB: predicated region body
PF: predicated region fallthrough
CT: control target
= control target key end

     0   :  { %15 = vsyncpa [#allocation3], 0  ;;  %s3140_s0 = inlined_call_operand.vmem [shape: f32[2,64,256], index: 0, kind: input, shape index: {}]   ;;  %s3141_s1 = inlined_call_operand.vmem [shape: f32[64,64], index: 1, kind: input, shape index: {}]   ;;  %s3142_s2 = inlined_call_operand.vmem [shape: f32[64,3], index: 2, kind: input, shape index: {}]   ;;  %s3143_s3 = inlined_call_operand.vmem [shape: f32[32,64], index: 3, kind: input, shape index: {}]   ;;  %s3144_s4 = inlined_call_operand.vmem [shape: f32[32,3], index: 4, kind: input, shape index: {}]   ;;  %s3145_s5 = inlined_call_operand.vmem [shape: f32[64,32], index: 5, kind: input, shape index: {}]   ;;  %s3146_s6 = inlined_call_operand.vmem [shape: f32[32,64], index: 6, kind: input, shape index: {}]   ;;  %s3147_s7 = inlined_call_operand.vmem [shape: f32[32,32], index: 7, kind: input, shape index: {}]   ;;  %s3148_s8 = inlined_call_operand.hbm [shape: f32[32,32], index: 8, kind: input, shape index: {}]   ;;  %s3149_s9 = inlined_call_operand.vmem [shape: f32[256,1], index: 9, kind: input, shape index: {}]   ;;  %s3150_s10 = inlined_call_operand.hbm [shape: f32[2,32,256], index: 10, kind: output, shape index: {}]  }
   0x1   :  { %16 = vsyncpa [#allocation4], 0 }
   0x2   :  { %18 = vsyncpa [#allocation4 + $0x1], 0  ;;  %s2250_s13 = smov 0   ;;  %s2252_s14 = smov 0  }
   0x3   :  { %s2254_s15 = smov 0   ;;  %s2256_s16 = smov 0  }
   0x4 LB: > { %s2271_s17 = sadd.s32 4294967295, %s2181_s16   ;;  %s1829_s18 = sadd.s32 4294967294, %s2181_s16   ;;  %s2181_s16 = sphi %s2256_s16, %s3158_s16   ;;  %s2177_s15 = sphi %s2254_s15, %s3157_s15   ;;  %s2173_s14 = sphi %s2252_s14, %s3156_s14   ;;  %s2169_s13 = sphi %s2250_s13, %s3155_s13  }
   0x5   : > { %s2275_s19 = sadd.s32 1, %s2181_s16   ;;  %s246_s20 = sadd.s32 1, %s2177_s15 }
   0x6   : > { %s243_s21 = ssub.s32 %s2181_s16, %s2275_s19  ;;  %p256_p0 = scmp.ne.s32.totalorder %s2177_s15, %s2173_s14 }
   0x7   : > { %p244_p1 = scmp.eq.s32.totalorder %s243_s21, 0  ;;  %p257_p2 = scmp.eq.s32.totalorder %s2271_s17, 1 }
   0x8   : > { %p262_p3 = scmp.ne.s32.totalorder %s2173_s14, %s2169_s13  ;;  %p263_p4 = scmp.eq.s32.totalorder %s1829_s18, 1 }
   0x9   : > { %s2286_s22 = scalar_select %p244_p1, %s2177_s15, %s246_s20  }
   0xa   : > { %p2288_p5 = por %p257_p2, %p256_p0  ;;  %p2292_p6 = por %p263_p4, %p262_p3 }
   0xb   : > { %p1830_p7 = scmp.ge.s32.totalorder %s2181_s16, 1  ;;  %p270_p8 = scmp.lt.s32.totalorder %s2181_s16, 3 }
   0xc   : > { %p1911_p9 = scmp.eq.s32.totalorder %s2271_s17, 0  ;;  %s302_s27 = sshll.u32 %s3148_s8, 4  ;;  %s303_s27 = int_to_ptr.hbm [resolvable:$true] %s302_s27 }
   0xd   : > { %p271_p10 = pnand %p1830_p7, %p270_p8  ;;  %s2183_s28 = smov [#allocation2]  }
   0xe   : > { %s304_s29 = sshll.u32 %s2183_s28, 4  ;;  %s2184_s30 = smov 128   ;;  %s305_s29 = int_to_ptr.vmem [resolvable:$true] %s304_s29 }
   0xf   : > { %p1903_p11 = pneg %p271_p10  ;;  %s2185_s11 = smov 8  }
  0x10   : > { %331 = sbr.rel (%p271_p10) target bundleno = 2757 (0xac5), region = 60 }
  0x11   : > { %p1904_p12 = pnand %p1911_p9, %p1903_p11 }
  0x13   : > { %1906 = dma.hbm_to_vmem [thread:$0]  (!%p1904_p12), %s303_s27, 512, %s305_s29, [#allocation3], %s2184_s30, %s2184_s30, %s2185_s11  }
  0x15   : > { %2160 = dma.done.wait (%p1911_p9), [#allocation3], 512  }
  0x16   : > { %2162 = vsyncadd (%p1911_p9), [#allocation3], 4294966784  ;;  %v2311_v0 = vld [vmem:[%s3149_s9 + $0x78] sm:$0xff]  ;;  %v2319_v2 = vld [vmem:[%s3149_s9 + $0x70] sm:$0xff]  ;;  %p370_p13 = scmp.lt.s32.totalorder %s2271_s17, 1  ;;  %vm521_vm0 = vcmask 523264  }
  0x17   : > { %v422_v1 = vld [vmem:[%s3149_s9 + $0xf8] sm:$0xff]  ;;  %423 = vmatpush.msra.mxu0 %v2311_v0  ;;  %v421_v3 = vld [vmem:[%s3149_s9 + $0xf0] sm:$0xff]  ;;  %v2328_v4 = vld [vmem:[%s3149_s9 + $0x68] sm:$0xff]  ;;  %vm627_vm1 = vcmask 7168   ;;  %vm721_vm2 = vcmask 261120   ;;  %s2187_s26 = smov 127  }
  0x18   : > { %464 = vmatpush.msra.mxu1 %v422_v1  ;;  %v420_v5 = vld [vmem:[%s3149_s9 + $0xe8] sm:$0xff]  ;;  %v2337_v6 = vld [vmem:[%s3149_s9 + $0x60] sm:$0xff]  ;;  %v2346_v8 = vld [vmem:[%s3149_s9 + $0x58] sm:$0xff]  ;;  %s371_s12 = scalar_select %p370_p13, %s2271_s17, 1 }
  0x19   : > { %424 = vmatpush.msra.mxu0 %v2319_v2  ;;  %v419_v7 = vld [vmem:[%s3149_s9 + $0xe0] sm:$0xff]  ;;  %v418_v9 = vld [vmem:[%s3149_s9 + $0xd8] sm:$0xff]  ;;  %v2355_v10 = vld [vmem:[%s3149_s9 + $0x50] sm:$0xff]  ;;  %s2188_s27 = smov 2   ;;  %s2189_s28 = smov 126  }
  0x1a   : > { %465 = vmatpush.msra.mxu1 %v421_v3  ;;  %v417_v11 = vld [vmem:[%s3149_s9 + $0xd0] sm:$0xff]  ;;  %v2364_v12 = vld [vmem:[%s3149_s9 + $0x48] sm:$0xff]  ;;  %v2373_v14 = vld [vmem:[%s3149_s9 + $0x40] sm:$0xff]  ;;  %s1887_s30 = sshll.u32 %s371_s12, 7  ;;  %s2135_s29 = scalar_lea.hbm %s3150_s10, 128 }
  0x1b   : > { %425 = vmatpush.msra.mxu0 %v2328_v4  ;;  %v416_v13 = vld [vmem:[%s3149_s9 + $0xc8] sm:$0xff]  ;;  %v415_v15 = vld [vmem:[%s3149_s9 + $0xc0] sm:$0xff]  ;;  %v2382_v16 = vld [vmem:[%s3149_s9 + $0x38] sm:$0xff]  ;;  %s2446_s11 = scalar_lea.vmem %s3140_s0, %s1887_s30  ;;  %s2186_s30 = smov 1  }
  0x1c   : > { %466 = vmatpush.msra.mxu1 %v420_v5  ;;  %v414_v17 = vld [vmem:[%s3149_s9 + $0xb8] sm:$0xff]  ;;  %v2392_v18 = vld [vmem:[%s3149_s9 + $0x30] sm:$0xff]  ;;  %v2401_v20 = vld [vmem:[%s3149_s9 + $0x28] sm:$0xff] }
  0x1d   : > { %426 = vmatpush.msra.mxu0 %v2337_v6  ;;  %v413_v19 = vld [vmem:[%s3149_s9 + $0xb0] sm:$0xff]  ;;  %v412_v21 = vld [vmem:[%s3149_s9 + $0xa8] sm:$0xff]  ;;  %v2411_v22 = vld [vmem:[%s3149_s9 + $0x20] sm:$0xff] }
  0x1e   : > { %467 = vmatpush.msra.mxu1 %v419_v7  ;;  %v411_v23 = vld [vmem:[%s3149_s9 + $0xa0] sm:$0xff]  ;;  %v2420_v24 = vld [vmem:[%s3149_s9 + $0x18] sm:$0xff]  ;;  %v2429_v26 = vld [vmem:[%s3149_s9 + $0x10] sm:$0xff] }
  0x1f   : > { %427 = vmatpush.msra.mxu0 %v2346_v8  ;;  %v410_v25 = vld [vmem:[%s3149_s9 + $0x98] sm:$0xff]  ;;  %v409_v27 = vld [vmem:[%s3149_s9 + $0x90] sm:$0xff]  ;;  %v2438_v28 = vld [vmem:[%s3149_s9 + $0x8] sm:$0xff] }
  0x20   : > { %468 = vmatpush.msra.mxu1 %v418_v9  ;;  %v408_v29 = vld [vmem:[%s3149_s9 + $0x88] sm:$0xff]  ;;  %v2452_v30 = vld [vmem:[%s3149_s9] sm:$0xff]  ;;  %v377_v34 = vld [vmem:[%s2446_s11 + $0x10] sm:$0xff] }
  0x21   : > { %428 = vmatpush.msra.mxu0 %v2355_v10  ;;  %v407_v31 = vld [vmem:[%s3149_s9 + $0x80] sm:$0xff]  ;;  %v376_v33 = vld [vmem:[%s2446_s11 + $0x8] sm:$0xff]  ;;  %v378_v35 = vld [vmem:[%s2446_s11 + $0x18] sm:$0xff] }
  0x22   : > { %469 = vmatpush.msra.mxu1 %v417_v11  ;;  %v375_v32 = vld [vmem:[%s2446_s11] sm:$0xff]  ;;  %v380_v37 = vld [vmem:[%s2446_s11 + $0x28] sm:$0xff]  ;;  %v381_v38 = vld [vmem:[%s2446_s11 + $0x30] sm:$0xff] }
  0x23   : > { %429 = vmatpush.msra.mxu0 %v2364_v12  ;;  %v379_v36 = vld [vmem:[%s2446_s11 + $0x20] sm:$0xff]  ;;  %v382_v39 = vld [vmem:[%s2446_s11 + $0x38] sm:$0xff]  ;;  %v384_v41 = vld [vmem:[%s2446_s11 + $0x48] sm:$0xff] }
  0x24   : > { %470 = vmatpush.msra.mxu1 %v416_v13  ;;  %v383_v40 = vld [vmem:[%s2446_s11 + $0x40] sm:$0xff]  ;;  %v385_v42 = vld [vmem:[%s2446_s11 + $0x50] sm:$0xff]  ;;  %v386_v43 = vld [vmem:[%s2446_s11 + $0x58] sm:$0xff] }
  0x25   : > { %430 = vmatpush.msra.mxu0 %v2373_v14  ;;  %v387_v44 = vld [vmem:[%s2446_s11 + $0x60] sm:$0xff]  ;;  %v388_v45 = vld [vmem:[%s2446_s11 + $0x68] sm:$0xff]  ;;  %v389_v46 = vld [vmem:[%s2446_s11 + $0x70] sm:$0xff] }
  0x26   : > { %471 = vmatpush.msra.mxu1 %v415_v15  ;;  %v390_v47 = vld [vmem:[%s2446_s11 + $0x78] sm:$0xff] }
  0x27   : > { %431 = vmatpush.msra.mxu0 %v2382_v16 }
  0x28   : > { %472 = vmatpush.msra.mxu1 %v414_v17  ;;  %v513_v17 = vld [vmem:[%s3141_s1] sm:$0xff] }
  0x29   : > { %432 = vmatpush.msra.mxu0 %v2392_v18 }
  0x2a   : > { %473 = vmatpush.msra.mxu1 %v413_v19  ;;  %v519_v19 = vld [vmem:[%s3141_s1 + $0x30] sm:$0xff] }
  0x2b   : > { %433 = vmatpush.msra.mxu0 %v2401_v20 }
  0x2c   : > { %474 = vmatpush.msra.mxu1 %v412_v21  ;;  %v514_v21 = vld [vmem:[%s3141_s1 + $0x8] sm:$0xff] }
  0x2d   : > { %434 = vmatpush.msra.mxu0 %v2411_v22 }
  0x2e   : > { %475 = vmatpush.msra.mxu1 %v411_v23  ;;  %v520_v23 = vld [vmem:[%s3141_s1 + $0x38] sm:$0xff] }
  0x2f   : > { %435 = vmatpush.msra.mxu0 %v2420_v24 }
  0x30   : > { %476 = vmatpush.msra.mxu1 %v410_v25  ;;  %v515_v25 = vld [vmem:[%s3141_s1 + $0x10] sm:$0xff] }
  0x31   : > { %436 = vmatpush.msra.mxu0 %v2429_v26 }
  0x32   : > { %477 = vmatpush.msra.mxu1 %v409_v27  ;;  %v516_v27 = vld [vmem:[%s3141_s1 + $0x18] sm:$0xff] }
  0x33   : > { %437 = vmatpush.msra.mxu0 %v2438_v28 }
  0x34   : > { %478 = vmatpush.msra.mxu1 %v408_v29  ;;  %v517_v29 = vld [vmem:[%s3141_s1 + $0x20] sm:$0xff] }
  0x35   : > { %438 = vmatpush.msra.mxu0 %v2452_v30 }
  0x36   : > { %479 = vmatpush.msra.mxu1 %v407_v31  ;;  %439 = vmatmul.f32.vlgmr.msra.gmra.mxu0 %v375_v32  ;;  %v518_v31 = vld [vmem:[%s3141_s1 + $0x28] sm:$0xff] }
  0x37   : > { %480 = vmatmul.f32.vlgmr.msra.gmra.mxu1 %v376_v33 }
  0x38   : > { %1325 = vmatpush.msrb.mxu1 %v2311_v0 }
  0x3a   : > { %1326 = vmatpush.msrb.mxu1 %v2319_v2 }
  0x3c   : > { %1327 = vmatpush.msrb.mxu1 %v2328_v4 }
  0x3e   : > { %1328 = vmatpush.msrb.mxu1 %v2337_v6  ;;  %442 = vmatmul.f32.gmra.mxu0 %v377_v34  ;;  %v2526_v34 = vld [vmem:[%s3142_s2 + $0x30] sm:$0xff] }
  0x3f   : > { %483 = vmatmul.f32.gmra.mxu1 %v378_v35 }
  0x40   : > { %1329 = vmatpush.msrb.mxu1 %v2346_v8 }
  0x42   : > { %1330 = vmatpush.msrb.mxu1 %v2355_v10 }
  0x44   : > { %1331 = vmatpush.msrb.mxu1 %v2364_v12 }
  0x46   : > { %1332 = vmatpush.msrb.mxu1 %v2373_v14  ;;  %445 = vmatmul.f32.gmra.mxu0 %v379_v36  ;;  %v2534_v36 = vld [vmem:[%s3142_s2 + $0x38] sm:$0xff] }
  0x47   : > { %486 = vmatmul.f32.gmra.mxu1 %v380_v37 }
  0x48   : > { %1333 = vmatpush.msrb.mxu1 %v2382_v16 }
  0x4a   : > { %1334 = vmatpush.msrb.mxu1 %v2392_v18 }
  0x4c   : > { %1335 = vmatpush.msrb.mxu1 %v2401_v20 }
  0x4e   : > { %1336 = vmatpush.msrb.mxu1 %v2411_v22  ;;  %448 = vmatmul.f32.gmra.mxu0 %v381_v38 }
  0x4f   : > { %489 = vmatmul.f32.gmra.mxu1 %v382_v39 }
  0x50   : > { %1337 = vmatpush.msrb.mxu1 %v2420_v24 }
  0x52   : > { %1338 = vmatpush.msrb.mxu1 %v2429_v26 }
  0x54   : > { %1339 = vmatpush.msrb.mxu1 %v2438_v28 }
  0x56   : > { %1340 = vmatpush.msrb.mxu1 %v2452_v30  ;;  %451 = vmatmul.f32.gmra.mxu0 %v383_v40 }
  0x57   : > { %492 = vmatmul.f32.gmra.mxu1 %v384_v41 }
  0x5e   : > { %454 = vmatmul.f32.gmra.mxu0 %v385_v42 }
  0x5f   : > { %495 = vmatmul.f32.gmra.mxu1 %v386_v43 }
  0x66   : > { %457 = vmatmul.f32.gmra.mxu0 %v387_v44  ;;  %v2547_v44 = vld [vmem:[%s3142_s2 + $0x10] sm:$0xff] }
  0x67   : > { %498 = vmatmul.f32.gmra.mxu1 %v388_v45  ;;  %v2552_v45 = vld [vmem:[%s3142_s2 + $0x18] sm:$0xff] }
  0x6e   : > { %460 = vmatmul.f32.gmra.mxu0 %v389_v46 }
  0x6f   : > { %501 = vmatmul.f32.gmra.mxu1 %v390_v47 }
  0xb3   : > { %v440_v48 = vpop.f32.mrf.mxu0 }
  0xb4   : > { %v481_v49 = vpop.f32.mrf.mxu1 }
  0xb5   : > { %v482_v50 = vadd.f32 %v481_v49, %v440_v48  ;;  %v2563_v49 = vld [vmem:[%s3142_s2 + $0x8] sm:$0xff] }
  0xbb   : > { %v443_v51 = vpop.f32.mrf.mxu0 }
  0xbc   : > { %v484_v52 = vpop.f32.mrf.mxu1 }
  0xbd   : > { %v485_v15 = vadd.f32 %v484_v52, %v443_v51  ;;  %v2572_v52 = vld [vmem:[%s3142_s2] sm:$0xff] }
  0xc3   : > { %v446_v53 = vpop.f32.mrf.mxu0 }
  0xc4   : > { %v487_v54 = vpop.f32.mrf.mxu1 }
  0xc5   : > { %v488_v13 = vadd.f32 %v487_v54, %v446_v53 }
  0xcb   : > { %v449_v55 = vpop.f32.mrf.mxu0 }
  0xcc   : > { %v490_v56 = vpop.f32.mrf.mxu1 }
  0xcd   : > { %v491_v11 = vadd.f32 %v490_v56, %v449_v55 }
  0xd3   : > { %v452_v57 = vpop.f32.mrf.mxu0 }
  0xd4   : > { %v493_v58 = vpop.f32.mrf.mxu1 }
  0xd5   : > { %v494_v9 = vadd.f32 %v493_v58, %v452_v57 }
  0xdb   : > { %v455_v59 = vpop.f32.mrf.mxu0 }
  0xdc   : > { %v496_v60 = vpop.f32.mrf.mxu1 }
  0xdd   : > { %v497_v7 = vadd.f32 %v496_v60, %v455_v59  ;;  %v2588_v59 = vld [vmem:[%s3142_s2 + $0x20] sm:$0xff] }
  0xe3   : > { %v458_v61 = vpop.f32.mrf.mxu0 }
  0xe4   : > { %v499_v62 = vpop.f32.mrf.mxu1 }
  0xe5   : > { %v500_v5 = vadd.f32 %v499_v62, %v458_v61  ;;  %v2593_v61 = vld [vmem:[%s3142_s2 + $0x28] sm:$0xff] }
  0xeb   : > { %v461_v63 = vpop.f32.mrf.mxu0 }
  0xec   : > { %v502_v1 = vpop.f32.mrf.mxu1 }
  0xed   : > { %v503_v3 = vadd.f32 %v502_v1, %v461_v63 }
  0xef   : > { %554 = vmatpush.msra.mxu2 %v503_v3  ;;  %1889 = vmatpush.msra.mxu3 %v503_v3 }
  0xf1   : > { %555 = vmatpush.msra.mxu2 %v500_v5  ;;  %1890 = vmatpush.msra.mxu3 %v500_v5 }
  0xf3   : > { %556 = vmatpush.msra.mxu2 %v497_v7  ;;  %1891 = vmatpush.msra.mxu3 %v497_v7 }
  0xf5   : > { %557 = vmatpush.msra.mxu2 %v494_v9  ;;  %1892 = vmatpush.msra.mxu3 %v494_v9 }
  0xf7   : > { %558 = vmatpush.msra.mxu2 %v491_v11  ;;  %1893 = vmatpush.msra.mxu3 %v491_v11 }
  0xf9   : > { %559 = vmatpush.msra.mxu2 %v488_v13  ;;  %1894 = vmatpush.msra.mxu3 %v488_v13 }
  0xfb   : > { %560 = vmatpush.msra.mxu2 %v485_v15  ;;  %1895 = vmatpush.msra.mxu3 %v485_v15 }
  0xfd   : > { %561 = vmatpush.msra.mxu2 %v482_v50  ;;  %1896 = vmatpush.msra.mxu3 %v482_v50 }
  0xfe   : > { %1838 = vmatmul.msk.f32.vlgmr.msra.gmra.mxu2 %vm521_vm0, %v513_v17  ;;  %1844 = vmatmul.msk.f32.vlgmr.msra.gmra.mxu3 %vm521_vm0, %v519_v19 }
 0x106   : > { %1839 = vmatmul.msk.f32.gmra.mxu2 %vm521_vm0, %v514_v21  ;;  %1845 = vmatmul.msk.f32.gmra.mxu3 %vm521_vm0, %v520_v23 }
 0x10e   : > { %1840 = vmatmul.msk.f32.gmra.mxu2 %vm521_vm0, %v515_v25 }
 0x116   : > { %1841 = vmatmul.msk.f32.gmra.mxu2 %vm521_vm0, %v516_v27 }
 0x11e   : > { %1842 = vmatmul.msk.f32.gmra.mxu2 %vm521_vm0, %v517_v29 }
 0x126   : > { %1843 = vmatmul.msk.f32.gmra.mxu2 %vm521_vm0, %v518_v31 }
 0x181   : > { %v563_v32 = vpop.f32.mrf.mxu2  ;;  %v581_v33 = vpop.f32.mrf.mxu3 }
 0x182   : > { %v2529_v35 = vadd.f32 %v581_v33, %v2526_v34  ;;  %v2578_v55 = vadd.f32 %v563_v32, %v2572_v52 }
 0x184   : > { %v593_v40 = vmul.f32 %v2529_v35, %v2529_v35  ;;  %v587_v58 = vmul.f32 %v2578_v55, %v2578_v55 }
 0x189   : > { %v566_v37 = vpop.f32.mrf.mxu2  ;;  %v584_v38 = vpop.f32.mrf.mxu3 }
 0x18a   : > { %v2537_v39 = vadd.f32 %v584_v38, %v2534_v36  ;;  %v2575_v53 = vadd.f32 %v566_v37, %v2563_v49 }
 0x18c   : > { %v594_v41 = vmul.f32 %v2537_v39, %v2537_v39  ;;  %v588_v57 = vmul.f32 %v2575_v53, %v2575_v53 }
 0x18e   : > { %v1958_v42 = vpack.i.bf16 %v593_v40, %v594_v41  ;;  %v1973_v60 = vpack.i.bf16 %v587_v58, %v588_v57 }
 0x190   : > { %1959 = vrot.lane.b32.xlu0 %v1958_v42, %s2186_s30 }
 0x191   : > { %v569_v43 = vpop.f32.mrf.mxu2 }
 0x192   : > { %v2555_v46 = vadd.f32 %v569_v43, %v2547_v44  ;;  %v636_v43 = vld [vmem:[%s3146_s6] sm:$0xff] }
 0x194   : > { %v589_v50 = vmul.f32 %v2555_v46, %v2555_v46 }
 0x199   : > { %v572_v47 = vpop.f32.mrf.mxu2 }
 0x19a   : > { %v2558_v48 = vadd.f32 %v572_v47, %v2552_v45 }
 0x19c   : > { %v590_v51 = vmul.f32 %v2558_v48, %v2558_v48 }
 0x19e   : > { %v1968_v54 = vpack.i.bf16 %v589_v50, %v590_v51  ;;  %v637_v50 = vld [vmem:[%s3146_s6 + $0x8] sm:$0xff]  ;;  %v638_v51 = vld [vmem:[%s3146_s6 + $0x10] sm:$0xff] }
 0x1a0   : > { %1969 = vrot.lane.b32.xlu1 %v1968_v54, %s2186_s30  ;;  %v639_v54 = vld [vmem:[%s3146_s6 + $0x18] sm:$0xff] }
 0x1a1   : > { %v575_v56 = vpop.f32.mrf.mxu2 }
 0x1a2   : > { %v2596_v62 = vadd.f32 %v575_v56, %v2588_v59 }
 0x1a4   : > { %v591_v3 = vmul.f32 %v2596_v62, %v2596_v62 }
 0x1a8   : > { %1974 = vrot.lane.b32.xlu1 %v1973_v60, %s2186_s30 }
 0x1a9   : > { %v578_v63 = vpop.f32.mrf.mxu2 }
 0x1aa   : > { %v2600_v1 = vadd.f32 %v578_v63, %v2593_v61 }
 0x1ac   : > { %v592_v5 = vmul.f32 %v2600_v1, %v2600_v1 }
 0x1ae   : > { %v1963_v7 = vpack.i.bf16 %v591_v3, %v592_v5 }
 0x1b0   : > { %1964 = vrot.lane.b32.xlu0 %v1963_v7, %s2186_s30 }
 0x202   : > { %v1960_v9 = vpop.permute.xlu0 %1959 }
 0x203   : > { %v1962_v11 = vunpack.i.h.bf16 %v1960_v9  ;;  %v1961_v13 = vunpack.i.l.bf16 %v1960_v9 }
 0x205   : > { %v635_v15 = vsel %vm627_vm1, %v2537_v39, %v1961_v13  ;;  %v634_v17 = vsel %vm627_vm1, %v2529_v35, %v1962_v11 }
 0x206   : > { %660 = vmatpush.msrb.mxu3 %v635_v15 }
 0x208   : > { %661 = vmatpush.msrb.mxu3 %v634_v17 }
 0x212   : > { %v1970_v19 = vpop.permute.xlu1 %1969 }
 0x213   : > { %v1971_v27 = vunpack.i.l.bf16 %v1970_v19  ;;  %v1972_v32 = vunpack.i.h.bf16 %v1970_v19 }
 0x215   : > { %v631_v38 = vsel %vm627_vm1, %v2558_v48, %v1971_v27  ;;  %v630_v41 = vsel %vm627_vm1, %v2555_v46, %v1972_v32 }
 0x21a   : > { %v1975_v31 = vpop.permute.xlu1 %1974 }
 0x21b   : > { %v1976_v37 = vunpack.i.l.bf16 %v1975_v31  ;;  %v1977_v40 = vunpack.i.h.bf16 %v1975_v31 }
 0x21d   : > { %v629_v42 = vsel %vm627_vm1, %v2575_v53, %v1976_v37  ;;  %v628_v47 = vsel %vm627_vm1, %v2578_v55, %v1977_v40 }
 0x222   : > { %v1965_v21 = vpop.permute.xlu0 %1964 }
 0x223   : > { %v1967_v23 = vunpack.i.h.bf16 %v1965_v21  ;;  %v1966_v25 = vunpack.i.l.bf16 %v1965_v21 }
 0x225   : > { %v633_v29 = vsel %vm627_vm1, %v2600_v1, %v1966_v25  ;;  %v632_v33 = vsel %vm627_vm1, %v2596_v62, %v1967_v23 }
 0x226   : > { %662 = vmatpush.msrb.mxu3 %v633_v29 }
 0x228   : > { %663 = vmatpush.msrb.mxu3 %v632_v33 }
 0x22a   : > { %664 = vmatpush.msrb.mxu3 %v631_v38  ;;  %v709_v38 = vld [vmem:[%s3145_s5] sm:$0xff] }
 0x22c   : > { %665 = vmatpush.msrb.mxu3 %v630_v41  ;;  %v710_v41 = vld [vmem:[%s3145_s5 + $0x8] sm:$0xff] }
 0x22e   : > { %666 = vmatpush.msrb.mxu3 %v629_v42 }
 0x230   : > { %667 = vmatpush.msrb.mxu3 %v628_v47 }
 0x231   : > { %1846 = vmatmul.msk.f32.vlgmr.msrb.gmra.mxu3 %vm521_vm0, %v636_v43 }
 0x239   : > { %1847 = vmatmul.msk.f32.gmra.mxu3 %vm521_vm0, %v637_v50 }
 0x241   : > { %1848 = vmatmul.msk.f32.gmra.mxu3 %vm521_vm0, %v638_v51 }
 0x249   : > { %1849 = vmatmul.msk.f32.gmra.mxu3 %vm521_vm0, %v639_v54 }
 0x2b4   : > { %v669_v56 = vpop.f32.mrf.mxu3 }
 0x2b5   : > { %v681_v57 = vmul.f32 %v669_v56, %v669_v56 }
 0x2b7   : > { %689 = vrot.lane.b32.xlu1 %v681_v57, %s2186_s30 }
 0x2bc   : > { %v672_v58 = vpop.f32.mrf.mxu3 }
 0x2bd   : > { %v682_v60 = vmul.f32 %v672_v58, %v672_v58 }
 0x2bf   : > { %691 = vrot.lane.b32.xlu0 %v682_v60, %s2186_s30 }
 0x2c4   : > { %v675_v63 = vpop.f32.mrf.mxu3 }
 0x2c5   : > { %v683_v7 = vmul.f32 %v675_v63, %v675_v63 }
 0x2cc   : > { %v678_v3 = vpop.f32.mrf.mxu3 }
 0x2cd   : > { %v684_v5 = vmul.f32 %v678_v3, %v678_v3 }
 0x2cf   : > { %695 = vrot.lane.b32.xlu2 %v684_v5, %s2186_s30 }
 0x2d7   : > { %693 = vrot.lane.b32.xlu2 %v683_v7, %s2186_s30 }
 0x329   : > { %v696_v9 = vpop.permute.xlu2 %695  ;;  %v690_v17 = vpop.permute.xlu1 %689 }
 0x32a   : > { %v704_v11 = vsub.f32 %v678_v3, %v696_v9  ;;  %v701_v23 = vsub.f32 %v669_v56, %v690_v17 }
 0x32c   : > { %v708_v13 = vmax.f32 %v704_v11, 0.0  ;;  %v705_v32 = vmax.f32 %v701_v23, 0.0 }
 0x32e   : > { %v720_v15 = vsel %vm627_vm1, %v678_v3, %v708_v13  ;;  %v717_v40 = vsel %vm627_vm1, %v669_v56, %v705_v32 }
 0x32f   : > { %758 = vmatpush.msra.mxu3 %v720_v15 }
 0x331   : > { %v692_v19 = vpop.permute.xlu0 %691  ;;  %v694_v21 = vpop.permute.xlu2 %693 }
 0x332   : > { %v702_v25 = vsub.f32 %v672_v58, %v692_v19  ;;  %v703_v27 = vsub.f32 %v675_v63, %v694_v21 }
 0x334   : > { %v706_v29 = vmax.f32 %v702_v25, 0.0  ;;  %v707_v31 = vmax.f32 %v703_v27, 0.0 }
 0x336   : > { %v719_v33 = vsel %vm627_vm1, %v675_v63, %v707_v31  ;;  %v718_v37 = vsel %vm627_vm1, %v672_v58, %v706_v29 }
 0x337   : > { %759 = vmatpush.msra.mxu3 %v719_v33 }
 0x339   : > { %760 = vmatpush.msra.mxu3 %v718_v37 }
 0x33b   : > { %761 = vmatpush.msra.mxu3 %v717_v40 }
 0x33c   : > { %1850 = vmatmul.msk.f32.vlgmr.msra.gmra.mxu3 %vm721_vm2, %v709_v38 }
 0x33d   : > { %1391 = vmatpush.msrb.mxu3 %v2311_v0  ;;  %v711_v0 = vld [vmem:[%s3145_s5 + $0x10] sm:$0xff] }
 0x33f   : > { %1392 = vmatpush.msrb.mxu3 %v2319_v2  ;;  %v712_v2 = vld [vmem:[%s3145_s5 + $0x18] sm:$0xff] }
 0x341   : > { %1393 = vmatpush.msrb.mxu3 %v2328_v4  ;;  %v713_v4 = vld [vmem:[%s3145_s5 + $0x20] sm:$0xff] }
 0x343   : > { %1394 = vmatpush.msrb.mxu3 %v2337_v6  ;;  %v714_v6 = vld [vmem:[%s3145_s5 + $0x28] sm:$0xff] }
 0x344   : > { %1851 = vmatmul.msk.f32.gmra.mxu3 %vm721_vm2, %v710_v41 }
 0x345   : > { %1395 = vmatpush.msrb.mxu3 %v2346_v8  ;;  %v715_v8 = vld [vmem:[%s3145_s5 + $0x30] sm:$0xff] }
 0x347   : > { %1396 = vmatpush.msrb.mxu3 %v2355_v10  ;;  %v716_v10 = vld [vmem:[%s3145_s5 + $0x38] sm:$0xff] }
 0x349   : > { %1397 = vmatpush.msrb.mxu3 %v2364_v12 }
 0x34b   : > { %1398 = vmatpush.msrb.mxu3 %v2373_v14 }
 0x34c   : > { %1852 = vmatmul.msk.f32.gmra.mxu3 %vm721_vm2, %v711_v0 }
 0x34d   : > { %1399 = vmatpush.msrb.mxu3 %v2382_v16 }
 0x34f   : > { %1400 = vmatpush.msrb.mxu3 %v2392_v18 }
 0x351   : > { %1401 = vmatpush.msrb.mxu3 %v2401_v20 }
 0x353   : > { %1402 = vmatpush.msrb.mxu3 %v2411_v22 }
 0x354   : > { %1853 = vmatmul.msk.f32.gmra.mxu3 %vm721_vm2, %v712_v2 }
 0x355   : > { %1403 = vmatpush.msrb.mxu3 %v2420_v24 }
 0x357   : > { %1404 = vmatpush.msrb.mxu3 %v2429_v26 }
 0x359   : > { %1405 = vmatpush.msrb.mxu3 %v2438_v28 }
 0x35b   : > { %1406 = vmatpush.msrb.mxu3 %v2452_v30 }
 0x35c   : > { %1854 = vmatmul.msk.f32.gmra.mxu3 %vm721_vm2, %v713_v4 }
 0x364   : > { %1855 = vmatmul.msk.f32.gmra.mxu3 %vm721_vm2, %v714_v6 }
 0x36c   : > { %1856 = vmatmul.msk.f32.gmra.mxu3 %vm721_vm2, %v715_v8 }
 0x374   : > { %1857 = vmatmul.msk.f32.gmra.mxu3 %vm721_vm2, %v716_v10 }
 0x3bf   : > { %v2695_v12 = vpop.f32.mrf.mxu3 }
 0x3c0   : > { %v2717_v43 = vadd.f32 1e-05, %v2695_v12 }
 0x3c7   : > { %v2697_v14 = vpop.f32.mrf.mxu3 }
 0x3c8   : > { %v2735_v9 = vadd.f32 1e-05, %v2697_v14 }
 0x3cf   : > { %v2699_v16 = vpop.f32.mrf.mxu3 }
 0x3d0   : > { %v789_v20 = vadd.f32 1e-05, %v2699_v16 }
 0x3d2   : > { %1997 = vrsqrt.f32 %v789_v20  ;;  %vm821_vm7 = vweird.f32 %v789_v20 }
 0x3d7   : > { %v2701_v18 = vpop.f32.mrf.mxu3 }
 0x3d8   : > { %v2707_v24 = vadd.f32 1e-05, %v2701_v18  ;;  %v2712_v30 = vpop.eup %1997 }
 0x3d9   : > { %v816_v42 = vmul.f32 %v2712_v30, %v789_v20  ;;  %vm822_vm6 = vweird.f32 %v2712_v30 }
 0x3da   : > { %vm2752_vm8 = vmor %vm821_vm7, %vm822_vm6  ;;  %vm831_vm13 = vweird.f32 %v2707_v24  ;;  %vm801_vm7 = vweird.f32 %v2717_v43 }
 0x3db   : > { %v817_v51 = vmul.f32 %v2712_v30, %v816_v42 }
 0x3dd   : > { %v818_v63 = vmul.f32 0.5, %v817_v51 }
 0x3df   : > { %v2704_v22 = vpop.f32.mrf.mxu3  ;;  %v819_v17 = vsub.f32 1.5, %v818_v63 }
 0x3e0   : > { %v2723_v54 = vadd.f32 1e-05, %v2704_v22 }
 0x3e1   : > { %v820_v38 = vmul.f32 %v2712_v30, %v819_v17 }
 0x3e3   : > { %v824_v10 = vsel %vm2752_vm8, %v2712_v30, %v820_v38  ;;  %vm841_vm8 = vweird.f32 %v2723_v54 }
 0x3e7   : > { %v2709_v26 = vpop.f32.mrf.mxu3 }
 0x3e8   : > { %v792_v28 = vadd.f32 1e-05, %v2709_v26 }
 0x3ea   : > { %1999 = vrsqrt.f32 %v792_v28  ;;  %vm851_vm4 = vweird.f32 %v792_v28 }
 0x3eb   : > { %2001 = vrsqrt.f32 %v2707_v24 }
 0x3ec   : > { %2003 = vrsqrt.f32 %v2717_v43 }
 0x3ef   : > { %v2719_v47 = vpop.f32.mrf.mxu3 }
 0x3f0   : > { %v2000_v50 = vpop.eup %1999  ;;  %v793_v56 = vadd.f32 1e-05, %v2719_v47 }
 0x3f1   : > { %v2726_v57 = vpop.eup %2001  ;;  %v846_v58 = vmul.f32 %v2000_v50, %v792_v28  ;;  %vm852_vm3 = vweird.f32 %v2000_v50 }
 0x3f2   : > { %2005 = vrsqrt.f32 %v793_v56  ;;  %v826_v3 = vmul.f32 %v2726_v57, %v2707_v24  ;;  %v2732_v7 = vpop.eup %2003  ;;  %vm853_vm5 = vmor %vm851_vm4, %vm852_vm3  ;;  %vm861_vm10 = vweird.f32 %v793_v56  ;;  %vm832_vm12 = vweird.f32 %v2726_v57 }
 0x3f3   : > { %v847_v60 = vmul.f32 %v2000_v50, %v846_v58  ;;  %2007 = vrsqrt.f32 %v2723_v54  ;;  %v796_v29 = vmul.f32 %v2732_v7, %v2717_v43  ;;  %vm833_vm15 = vmor %vm831_vm13, %vm832_vm12  ;;  %vm811_vm12 = vweird.f32 %v2735_v9 }
 0x3f4   : > { %v827_v19 = vmul.f32 %v2726_v57, %v826_v3  ;;  %v877_v3 = vmul.f32 %v824_v10, %v2547_v44 }
 0x3f5   : > { %v848_v5 = vmul.f32 0.5, %v847_v60  ;;  %v797_v6 = vmul.f32 %v2732_v7, %v796_v29 }
 0x3f6   : > { %v828_v33 = vmul.f32 0.5, %v827_v19 }
 0x3f7   : > { %v849_v11 = vsub.f32 1.5, %v848_v5  ;;  %v2737_v13 = vpop.f32.mrf.mxu3  ;;  %v798_v60 = vmul.f32 0.5, %v797_v6 }
 0x3f8   : > { %v2006_v15 = vpop.eup %2005  ;;  %v794_v21 = vadd.f32 1e-05, %v2737_v13  ;;  %v829_v8 = vsub.f32 1.5, %v828_v33 }
 0x3f9   : > { %v856_v23 = vmul.f32 %v2006_v15, %v793_v56  ;;  %v850_v25 = vmul.f32 %v2000_v50, %v849_v11  ;;  %v2741_v27 = vpop.eup %2007  ;;  %vm862_vm9 = vweird.f32 %v2006_v15 }
 0x3fa   : > { %2009 = vrsqrt.f32 %v794_v21  ;;  %v836_v40 = vmul.f32 %v2741_v27, %v2723_v54  ;;  %vm863_vm11 = vmor %vm861_vm10, %vm862_vm9  ;;  %v830_v30 = vmul.f32 %v2726_v57, %v829_v8  ;;  %vm871_vm3 = vweird.f32 %v794_v21 }
 0x3fb   : > { %2011 = vrsqrt.f32 %v2735_v9  ;;  %v857_v31 = vmul.f32 %v2006_v15, %v856_v23  ;;  %v854_v32 = vsel %vm853_vm5, %v2000_v50, %v850_v25  ;;  %vm802_vm5 = vweird.f32 %v2732_v7 }
 0x3fc   : > { %v880_v37 = vmul.f32 %v854_v32, %v2593_v61  ;;  %v837_v20 = vmul.f32 %v2741_v27, %v836_v40  ;;  %v834_v25 = vsel %vm833_vm15, %v2726_v57, %v830_v30  ;;  %vm842_vm6 = vweird.f32 %v2741_v27  ;;  %vm803_vm9 = vmor %vm801_vm7, %vm802_vm5 }
 0x3fd   : > { %v858_v41 = vmul.f32 0.5, %v857_v31  ;;  %v878_v32 = vmul.f32 %v834_v25, %v2552_v45  ;;  %vm843_vm10 = vmor %vm841_vm8, %vm842_vm6 }
 0x3fe   : > { %901 = vrot.lane.b32.xlu1 %v880_v37, %s2187_s26  ;;  %v838_v11 = vmul.f32 0.5, %v837_v20 }
 0x3ff   : > { %v859_v0 = vsub.f32 1.5, %v858_v41 }
 0x400   : > { %v2010_v4 = vpop.eup %2009  ;;  %v839_v23 = vsub.f32 1.5, %v838_v11 }
 0x401   : > { %v2012_v28 = vpop.eup %2011  ;;  %v866_v42 = vmul.f32 %v2010_v4, %v794_v21  ;;  %v860_v50 = vmul.f32 %v2006_v15, %v859_v0  ;;  %vm872_vm14 = vweird.f32 %v2010_v4 }
 0x402   : > { %v806_v63 = vmul.f32 %v2012_v28, %v2735_v9  ;;  %vm873_vm4 = vmor %vm871_vm3, %vm872_vm14  ;;  %v840_v38 = vmul.f32 %v2741_v27, %v839_v23  ;;  %v2190_v23 = vmov 0  }
 0x403   : > { %v867_v51 = vmul.f32 %v2010_v4, %v866_v42  ;;  %v864_v58 = vsel %vm863_vm11, %v2006_v15, %v860_v50  ;;  %v799_v15 = vsub.f32 1.5, %v798_v60  ;;  %vm812_vm11 = vweird.f32 %v2012_v28  ;;  %1979 = vset.pattern.permute.xlu1 %v2190_v23  ;;  %1978 = vset.pattern.permute.xlu0 %v2190_v23 }
 0x404   : > { %v881_v5 = vmul.f32 %v864_v58, %v2526_v34  ;;  %v807_v19 = vmul.f32 %v2012_v28, %v806_v63  ;;  %v844_v40 = vsel %vm843_vm10, %v2741_v27, %v840_v38  ;;  %vm813_vm13 = vmor %vm811_vm12, %vm812_vm11  ;;  %1980 = vset.pattern.permute.xlu2 %v2190_v23 }
 0x405   : > { %v868_v17 = vmul.f32 0.5, %v867_v51  ;;  %v800_v24 = vmul.f32 %v2732_v7, %v799_v15  ;;  %v879_v0 = vmul.f32 %v844_v40, %v2588_v59 }
 0x406   : > { %895 = vrot.lane.b32.xlu1 %v877_v3, %s2187_s26  ;;  %903 = vrot.lane.b32.xlu0 %v881_v5, %s2187_s26  ;;  %v808_v37 = vmul.f32 0.5, %v807_v19 }
 0x407   : > { %v869_v56 = vsub.f32 1.5, %v868_v17  ;;  %v804_v21 = vsel %vm803_vm9, %v2732_v7, %v800_v24 }
 0x408   : > { %v809_v57 = vsub.f32 1.5, %v808_v37  ;;  %v875_v41 = vmul.f32 %v804_v21, %v2572_v52 }
 0x409   : > { %v870_v29 = vmul.f32 %v2010_v4, %v869_v56 }
 0x40a   : > { %v810_v2 = vmul.f32 %v2012_v28, %v809_v57 }
 0x40b   : > { %v874_v31 = vsel %vm873_vm4, %v2010_v4, %v870_v29 }
 0x40c   : > { %v882_v33 = vmul.f32 %v874_v31, %v2534_v36  ;;  %v814_v43 = vsel %vm813_vm13, %v2012_v28, %v810_v2 }
 0x40d   : > { %v876_v54 = vmul.f32 %v814_v43, %v2563_v49 }
 0x40e   : > { %897 = vrot.lane.b32.xlu0 %v878_v32, %s2187_s26  ;;  %905 = vrot.lane.b32.xlu2 %v882_v33, %s2187_s26 }
 0x416   : > { %891 = vrot.lane.b32.xlu0 %v875_v41, %s2187_s26  ;;  %899 = vrot.lane.b32.xlu2 %v879_v0, %s2187_s26 }
 0x41e   : > { %893 = vrot.lane.b32.xlu2 %v876_v54, %s2187_s26 }
 0x468   : > { %v2789_v7 = vpop.permute.xlu2 %905 }
 0x469   : > { %v922_v27 = vmul.f32 %v2789_v7, %v2737_v13  ;;  %v970_v24 = vmul.f32 %v2789_v7, %v2537_v39 }
 0x46b   : > { %945 = vrot.lane.b32.xlu1 %v922_v27, %s2188_s27 }
 0x470   : > { %v902_v4 = vpop.permute.xlu1 %901  ;;  %v2794_v6 = vpop.permute.xlu2 %899 }
 0x471   : > { %v920_v8 = vmul.f32 %v902_v4, %v2709_v26  ;;  %v919_v9 = vmul.f32 %v2794_v6, %v2704_v22  ;;  %v968_v15 = vmul.f32 %v902_v4, %v2600_v1  ;;  %v967_v4 = vmul.f32 %v2794_v6, %v2596_v62 }
 0x473   : > { %941 = vrot.lane.b32.xlu0 %v920_v8, %s2188_s27  ;;  %939 = vrot.lane.b32.xlu1 %v919_v9, %s2188_s27 }
 0x478   : > { %v896_v10 = vpop.permute.xlu1 %895  ;;  %v904_v28 = vpop.permute.xlu0 %903 }
 0x479   : > { %v917_v20 = vmul.f32 %v896_v10, %v2699_v16  ;;  %v921_v13 = vmul.f32 %v904_v28, %v2719_v47  ;;  %v2803_v42 = vpop.permute.xlu2 %893  ;;  %v969_v25 = vmul.f32 %v904_v28, %v2529_v35 }
 0x47a   : > { %v916_v50 = vmul.f32 %v2803_v42, %v2697_v14 }
 0x47b   : > { %935 = vrot.lane.b32.xlu0 %v917_v20, %s2188_s27  ;;  %943 = vrot.lane.b32.xlu2 %v921_v13, %s2188_s27 }
 0x47c   : > { %933 = vrot.lane.b32.xlu1 %v916_v50, %s2188_s27 }
 0x480   : > { %v898_v22 = vpop.permute.xlu0 %897 }
 0x481   : > { %v918_v26 = vmul.f32 %v898_v22, %v2701_v18  ;;  %v966_v38 = vmul.f32 %v898_v22, %v2558_v48 }
 0x483   : > { %937 = vrot.lane.b32.xlu2 %v918_v26, %s2188_s27 }
 0x488   : > { %v2812_v51 = vpop.permute.xlu0 %891 }
 0x489   : > { %v915_v16 = vmul.f32 %v2812_v51, %v2695_v12  ;;  %v963_v48 = vmul.f32 %v2812_v51, %v2578_v55 }
 0x48b   : > { %931 = vrot.lane.b32.xlu2 %v915_v16, %s2188_s27 }
 0x4d5   : > { %v944_v47 = vpop.permute.xlu2 %943 }
 0x4d6   : > { %v961_v14 = vsub.f32 %v2526_v34, %v944_v47 }
 0x4d8   : > { %991 = vrot.lane.b32.xlu1 %v961_v14, %s2189_s28 }
 0x4dd   : > { %v946_v58 = vpop.permute.xlu1 %945  ;;  %v938_v60 = vpop.permute.xlu2 %937 }
 0x4de   : > { %v962_v63 = vsub.f32 %v2534_v36, %v946_v58  ;;  %v958_v18 = vsub.f32 %v2552_v45, %v938_v60 }
 0x4e0   : > { %993 = vrot.lane.b32.xlu0 %v962_v63, %s2189_s28  ;;  %985 = vrot.lane.b32.xlu1 %v958_v18, %s2189_s28 }
 0x4e5   : > { %v942_v3 = vpop.permute.xlu0 %941  ;;  %v940_v5 = vpop.permute.xlu1 %939 }
 0x4e6   : > { %v960_v11 = vsub.f32 %v2593_v61, %v942_v3  ;;  %v959_v12 = vsub.f32 %v2588_v59, %v940_v5  ;;  %v932_v17 = vpop.permute.xlu2 %931  ;;  %v964_v5 = vmul.f32 %v2803_v42, %v2575_v53 }
 0x4e7   : > { %v955_v30 = vsub.f32 %v2572_v52, %v932_v17  ;;  %v965_v52 = vmul.f32 %v896_v10, %v2555_v46 }
 0x4e8   : > { %989 = vrot.lane.b32.xlu2 %v960_v11, %s2189_s28  ;;  %987 = vrot.lane.b32.xlu0 %v959_v12, %s2189_s28 }
 0x4e9   : > { %979 = vrot.lane.b32.xlu1 %v955_v30, %s2189_s28 }
 0x4ed   : > { %v936_v34 = vpop.permute.xlu0 %935 }
 0x4ee   : > { %v957_v56 = vsub.f32 %v2547_v44, %v936_v34  ;;  %v934_v36 = vpop.permute.xlu1 %933 }
 0x4ef   : > { %v956_v45 = vsub.f32 %v2563_v49, %v934_v36 }
 0x4f0   : > { %983 = vrot.lane.b32.xlu2 %v957_v56, %s2189_s28 }
 0x4f1   : > { %981 = vrot.lane.b32.xlu0 %v956_v45, %s2189_s28 }
 0x542   : > { %v990_v19 = vpop.permute.xlu2 %989 }
 0x543   : > { %v1008_v61 = vadd.f32 %v990_v19, %v968_v15 }
 0x545   : > { %v1863_v59 = vmul.f32 -1.442695, %v1008_v61 }
 0x547   : > { %2013 = vpow2.f32 %v1863_v59 }
 0x54a   : > { %v992_v44 = vpop.permute.xlu1 %991  ;;  %v984_v29 = vpop.permute.xlu2 %983 }
 0x54b   : > { %v1009_v31 = vadd.f32 %v992_v44, %v969_v25  ;;  %v1005_v49 = vadd.f32 %v984_v29, %v965_v52 }
 0x54d   : > { %v2014_v32 = vpop.eup %2013  ;;  %v1864_v33 = vmul.f32 -1.442695, %v1009_v31  ;;  %v1860_v37 = vmul.f32 -1.442695, %v1005_v49 }
 0x54e   : > { %v1040_v1 = vadd.f32 1.0, %v2014_v32 }
 0x54f   : > { %2015 = vpow2.f32 %v1864_v33 }
 0x550   : > { %2017 = vrcp.f32 %v1040_v1  ;;  %v1129_v9 = vand.u32 2147483648, %v1040_v1  ;;  %v1127_v13 = vand.u32 2147483647, %v1040_v1  ;;  %vm1123_vm15 = vweird.f32 %v1040_v1 }
 0x551   : > { %2019 = vpow2.f32 %v1860_v37 }
 0x552   : > { %v994_v57 = vpop.permute.xlu0 %993  ;;  %v986_v46 = vpop.permute.xlu1 %985  ;;  %v1130_v51 = vor.u32 1.1754944e-38, %v1129_v9  ;;  %vm1128_vm4 = vcmp.eq.f32.partialorder %v1127_v13, 8.507059e+37 }
 0x553   : > { %v1010_v21 = vadd.f32 %v994_v57, %v970_v24  ;;  %v1006_v35 = vadd.f32 %v986_v46, %v966_v38 }
 0x555   : > { %v2016_v40 = vpop.eup %2015  ;;  %v1865_v41 = vmul.f32 -1.442695, %v1010_v21  ;;  %v1861_v0 = vmul.f32 -1.442695, %v1006_v35 }
 0x556   : > { %v2018_v2 = vpop.eup %2017  ;;  %v1041_v43 = vadd.f32 1.0, %v2016_v40 }
 0x557   : > { %v2020_v54 = vpop.eup %2019  ;;  %2021 = vpow2.f32 %v1865_v41  ;;  %v1119_v27 = vmul.f32 %v2018_v2, %v1040_v1  ;;  %vm1124_vm14 = vweird.f32 %v2018_v2 }
 0x558   : > { %2023 = vrcp.f32 %v1041_v43  ;;  %v2835_v7 = vadd.f32 1.0, %v2020_v54  ;;  %vm1125_vm3 = vmor %vm1123_vm15, %vm1124_vm14  ;;  %v1144_v11 = vand.u32 2147483648, %v1041_v43  ;;  %v1142_v30 = vand.u32 2147483647, %v1041_v43 }
 0x559   : > { %2025 = vpow2.f32 %v1861_v0  ;;  %v1120_v39 = vsub.f32 1.0, %v1119_v27  ;;  %vm1138_vm6 = vweird.f32 %v1041_v43 }
 0x55a   : > { %v988_v8 = vpop.permute.xlu0 %987  ;;  %2027 = vrcp.f32 %v2835_v7  ;;  %v1145_v53 = vor.u32 1.1754944e-38, %v1144_v11  ;;  %vm1143_vm8 = vcmp.eq.f32.partialorder %v1142_v30, 8.507059e+37  ;;  %v1082_v11 = vand.u32 2147483647, %v2835_v7 }
 0x55b   : > { %v1007_v10 = vadd.f32 %v988_v8, %v967_v4  ;;  %v980_v28 = vpop.permute.xlu1 %979  ;;  %v1121_v20 = vmul.f32 %v2018_v2, %v1120_v39 }
 0x55c   : > { %v1003_v50 = vadd.f32 %v980_v28, %v963_v48 }
 0x55d   : > { %v2022_v22 = vpop.eup %2021  ;;  %v1862_v26 = vmul.f32 -1.442695, %v1007_v10  ;;  %v1122_v16 = vadd.f32 %v2018_v2, %v1121_v20 }
 0x55e   : > { %v2024_v62 = vpop.eup %2023  ;;  %v2838_v6 = vadd.f32 1.0, %v2022_v22  ;;  %v1858_v55 = vmul.f32 -1.442695, %v1003_v50 }
 0x55f   : > { %v2026_v47 = vpop.eup %2025  ;;  %2029 = vpow2.f32 %v1862_v26  ;;  %v1126_v14 = vsel %vm1125_vm3, %v2018_v2, %v1122_v16  ;;  %v1134_v58 = vmul.f32 %v2024_v62, %v1041_v43  ;;  %vm1139_vm5 = vweird.f32 %v2024_v62 }
 0x560   : > { %2031 = vrcp.f32 %v2838_v6  ;;  %v2841_v60 = vadd.f32 1.0, %v2026_v47  ;;  %v1131_v63 = vsel %vm1128_vm4, %v1130_v51, %v1126_v14  ;;  %v2846_v34 = vpop.eup %2027  ;;  %vm1140_vm7 = vmor %vm1138_vm6, %vm1139_vm5  ;;  %v1157_v33 = vand.u32 2147483647, %v2838_v6 }
 0x561   : > { %2033 = vpow2.f32 %v1858_v55  ;;  %v1168_v18 = vadd.f32 1.0, %v1131_v63  ;;  %v1135_v3 = vsub.f32 1.0, %v1134_v58  ;;  %v1074_v29 = vmul.f32 %v2846_v34, %v2835_v7 }
 0x562   : > { %2035 = vrcp.f32 %v2841_v60  ;;  %v1159_v37 = vand.u32 2147483648, %v2838_v6  ;;  %v1097_v38 = vand.u32 2147483647, %v2841_v60  ;;  %v1099_v57 = vand.u32 2147483648, %v2841_v60 }
 0x563   : > { %v982_v12 = vpop.permute.xlu0 %981  ;;  %1198 = vperm.xlu1 %1979, %v1168_v18   ;;  %v1136_v17 = vmul.f32 %v2024_v62, %v1135_v3  ;;  %v1075_v46 = vsub.f32 1.0, %v1074_v29  ;;  %vm1153_vm10 = vweird.f32 %v2838_v6  ;;  %vm1158_vm13 = vcmp.eq.f32.partialorder %v1157_v33, 8.507059e+37  ;;  %v2893_v29 = vld [vmem:[%s3144_s4 + $0x10] sm:$0xff]  ;;  %v2911_v33 = vld [vmem:[%s3144_s4 + $0x18] sm:$0xff] }
 0x564   : > { %v1004_v56 = vadd.f32 %v982_v12, %v964_v5  ;;  %v1160_v41 = vor.u32 1.1754944e-38, %v1159_v37  ;;  %vm1093_vm14 = vweird.f32 %v2841_v60  ;;  %vm1098_vm15 = vcmp.eq.f32.partialorder %v1097_v38, 8.507059e+37  ;;  %v2054_v38 = vld [vmem:[%s2446_s11 + $0x78] sm:$0xff] }
 0x565   : > { %v2030_v36 = vpop.eup %2029  ;;  %v1137_v45 = vadd.f32 %v2024_v62, %v1136_v17  ;;  %v1100_v48 = vor.u32 1.1754944e-38, %v1099_v57  ;;  %v1076_v8 = vmul.f32 %v2846_v34, %v1075_v46  ;;  %v1084_v12 = vand.u32 2147483648, %v2835_v7 }
 0x566   : > { %v2032_v15 = vpop.eup %2031  ;;  %v2848_v19 = vadd.f32 1.0, %v2030_v36  ;;  %v1859_v61 = vmul.f32 -1.442695, %v1004_v56 }
 0x567   : > { %v2034_v42 = vpop.eup %2033  ;;  %v1141_v23 = vsel %vm1140_vm7, %v2024_v62, %v1137_v45  ;;  %v1149_v59 = vmul.f32 %v2032_v15, %v2838_v6  ;;  %vm1154_vm9 = vweird.f32 %v2032_v15  ;;  %v1077_v63 = vadd.f32 %v2846_v34, %v1076_v8  ;;  %v2060_v8 = vld [vmem:[%s2446_s11 + $0x48] sm:$0xff] }
 0x568   : > { %v2036_v52 = vpop.eup %2035  ;;  %2037 = vrcp.f32 %v2848_v19  ;;  %v2852_v25 = vadd.f32 1.0, %v2034_v42  ;;  %v1146_v44 = vsel %vm1143_vm8, %v1145_v53, %v1141_v23  ;;  %vm1155_vm12 = vmor %vm1153_vm10, %vm1154_vm9  ;;  %v1112_v50 = vand.u32 2147483647, %v2848_v19 }
 0x569   : > { %2039 = vpow2.f32 %v1859_v61  ;;  %v1169_v31 = vadd.f32 1.0, %v1146_v44  ;;  %v1150_v49 = vsub.f32 1.0, %v1149_v59  ;;  %v1089_v32 = vmul.f32 %v2036_v52, %v2841_v60 }
 0x56a   : > { %2041 = vrcp.f32 %v2852_v25  ;;  %vm1094_vm11 = vweird.f32 %v2036_v52  ;;  %v1114_v22 = vand.u32 2147483648, %v2848_v19  ;;  %vm1108_vm5 = vweird.f32 %v2848_v19 }
 0x56b   : > { %1203 = vperm.xlu0 %1978, %v1169_v31   ;;  %v1151_v1 = vmul.f32 %v2032_v15, %v1150_v49  ;;  %v1090_v24 = vsub.f32 1.0, %v1089_v32  ;;  %vm1095_vm3 = vmor %vm1093_vm14, %vm1094_vm11  ;;  %v1054_v6 = vand.u32 2147483648, %v2852_v25  ;;  %v1052_v47 = vand.u32 2147483647, %v2852_v25  ;;  %v2899_v49 = vld [vmem:[%s3144_s4] sm:$0xff]  ;;  %v2904_v32 = vld [vmem:[%s3144_s4 + $0x8] sm:$0xff] }
 0x56c   : > { %v1115_v14 = vor.u32 1.1754944e-38, %v1114_v22  ;;  %vm1048_vm8 = vweird.f32 %v2852_v25  ;;  %vm1078_vm9 = vweird.f32 %v2835_v7  ;;  %vm1079_vm10 = vweird.f32 %v2846_v34 }
 0x56d   : > { %v1152_v21 = vadd.f32 %v2032_v15, %v1151_v1  ;;  %v1091_v35 = vmul.f32 %v2036_v52, %v1090_v24  ;;  %vm1113_vm11 = vcmp.eq.f32.partialorder %v1112_v50, 8.507059e+37  ;;  %v1055_v5 = vor.u32 1.1754944e-38, %v1054_v6  ;;  %vm1080_vm14 = vmor %vm1078_vm9, %vm1079_vm10  ;;  %v2053_v1 = vld [vmem:[%s2446_s11 + $0x70] sm:$0xff]  ;;  %v2062_v50 = vld [vmem:[%s2446_s11 + $0x38] sm:$0xff] }
 0x56e   : > { %v2038_v40 = vpop.eup %2037  ;;  %v1085_v53 = vor.u32 1.1754944e-38, %v1084_v12  ;;  %v2069_v12 = vld [vmem:[%s3149_s9 + $0xf8] sm:$0xff] }
 0x56f   : > { %v2040_v0 = vpop.eup %2039  ;;  %v1156_v2 = vsel %vm1155_vm12, %v2032_v15, %v1152_v21  ;;  %v1092_v43 = vadd.f32 %v2036_v52, %v1091_v35  ;;  %v1104_v54 = vmul.f32 %v2038_v40, %v2848_v19  ;;  %vm1109_vm4 = vweird.f32 %v2038_v40 }
 0x570   : > { %v2042_v27 = vpop.eup %2041  ;;  %v2865_v4 = vadd.f32 1.0, %v2040_v0  ;;  %v1161_v39 = vsel %vm1158_vm13, %v1160_v41, %v1156_v2  ;;  %vm1110_vm7 = vmor %vm1108_vm5, %vm1109_vm4  ;;  %vm1053_vm13 = vcmp.eq.f32.partialorder %v1052_v47, 8.507059e+37  ;;  %v1081_v19 = vsel %vm1080_vm14, %v2846_v34, %v1077_v63  ;;  %v2056_v0 = vld [vmem:[%s2446_s11 + $0x68] sm:$0xff]  ;;  %v2065_v47 = vld [vmem:[%s2446_s11 + $0x10] sm:$0xff] }
 0x571   : > { %v1170_v9 = vadd.f32 1.0, %v1161_v39  ;;  %v1096_v10 = vsel %vm1095_vm3, %v2036_v52, %v1092_v43  ;;  %v1105_v28 = vsub.f32 1.0, %v1104_v54  ;;  %v1044_v20 = vmul.f32 %v2042_v27, %v2852_v25  ;;  %v2057_v43 = vld [vmem:[%s2446_s11 + $0x50] sm:$0xff]  ;;  %v2059_v39 = vld [vmem:[%s2446_s11 + $0x40] sm:$0xff] }
 0x572   : > { %2043 = vrcp.f32 %v2865_v4  ;;  %v1101_v13 = vsel %vm1098_vm15, %v1100_v48, %v1096_v10  ;;  %vm1049_vm6 = vweird.f32 %v2042_v27  ;;  %v1069_v61 = vand.u32 2147483648, %v2865_v4  ;;  %v2067_v63 = vld [vmem:[%s2446_s11] sm:$0xff] }
 0x573   : > { %1208 = vperm.xlu2 %1980, %v1170_v9   ;;  %v1166_v26 = vadd.f32 1.0, %v1101_v13  ;;  %v1106_v16 = vmul.f32 %v2038_v40, %v1105_v28  ;;  %v1045_v62 = vsub.f32 1.0, %v1044_v20  ;;  %vm1050_vm12 = vmor %vm1048_vm8, %vm1049_vm6  ;;  %v1067_v23 = vand.u32 2147483647, %v2865_v4  ;;  %v2061_v20 = vld [vmem:[%s2446_s11 + $0x30] sm:$0xff] }
 0x574   : > { %vm1083_vm3 = vcmp.eq.f32.partialorder %v1082_v11, 8.507059e+37  ;;  %vm1063_vm4 = vweird.f32 %v2865_v4  ;;  %v1070_v7 = vor.u32 1.1754944e-38, %v1069_v61  ;;  %v1231_v11 = vld [vmem:[%s3143_s3] sm:$0xff]  ;;  %v2075_v61 = vld [vmem:[%s3149_s9 + $0xc8] sm:$0xff] }
 0x575   : > { %1188 = vperm.xlu1 %1979, %v1166_v26   ;;  %v1107_v55 = vadd.f32 %v2038_v40, %v1106_v16  ;;  %v1046_v51 = vmul.f32 %v2042_v27, %v1045_v62  ;;  %v1086_v59 = vsel %vm1083_vm3, %v1085_v53, %v1081_v19  ;;  %vm1068_vm6 = vcmp.eq.f32.partialorder %v1067_v23, 8.507059e+37  ;;  %v2063_v26 = vld [vmem:[%s2446_s11 + $0x20] sm:$0xff]  ;;  %v2064_v62 = vld [vmem:[%s2446_s11 + $0x28] sm:$0xff]  ;;  %v1233_v19 = vld [vmem:[%s3143_s3 + $0x10] sm:$0xff] }
 0x576   : > { %v1165_v44 = vadd.f32 1.0, %v1086_v59  ;;  %v2076_v53 = vld [vmem:[%s3149_s9 + $0xc0] sm:$0xff]  ;;  %v2078_v23 = vld [vmem:[%s3149_s9 + $0xb0] sm:$0xff]  ;;  %v1234_v59 = vld [vmem:[%s3143_s3 + $0x18] sm:$0xff] }
 0x577   : > { %v1111_v58 = vsel %vm1110_vm7, %v2038_v40, %v1107_v55  ;;  %v1047_v60 = vadd.f32 %v2042_v27, %v1046_v51  ;;  %v2055_v40 = vld [vmem:[%s2446_s11 + $0x60] sm:$0xff] }
 0x578   : > { %v2044_v18 = vpop.eup %2043  ;;  %v1116_v3 = vsel %vm1113_vm11, %v1115_v14, %v1111_v58  ;;  %v2066_v58 = vld [vmem:[%s2446_s11 + $0x18] sm:$0xff] }
 0x579   : > { %v1167_v17 = vadd.f32 1.0, %v1116_v3  ;;  %v1051_v30 = vsel %vm1050_vm12, %v2042_v27, %v1047_v60  ;;  %v1059_v56 = vmul.f32 %v2044_v18, %v2865_v4  ;;  %vm1064_vm15 = vweird.f32 %v2044_v18  ;;  %v2058_v27 = vld [vmem:[%s2446_s11 + $0x58] sm:$0xff]  ;;  %v2068_v3 = vld [vmem:[%s2446_s11 + $0x8] sm:$0xff] }
 0x57a   : > { %v1056_v36 = vsel %vm1053_vm13, %v1055_v5, %v1051_v30  ;;  %vm1065_vm5 = vmor %vm1063_vm4, %vm1064_vm15  ;;  %v1232_v30 = vld [vmem:[%s3143_s3 + $0x8] sm:$0xff] }
 0x57b   : > { %1193 = vperm.xlu2 %1980, %v1167_v17   ;;  %v1163_v45 = vadd.f32 1.0, %v1056_v36  ;;  %v1060_v15 = vsub.f32 1.0, %v1059_v56  ;;  %v2070_v17 = vld [vmem:[%s3149_s9 + $0xf0] sm:$0xff]  ;;  %v2071_v56 = vld [vmem:[%s3149_s9 + $0xe8] sm:$0xff]  ;;  %v2072_v36 = vld [vmem:[%s3149_s9 + $0xe0] sm:$0xff] }
 0x57d   : > { %1173 = vperm.xlu1 %1979, %v1163_v45   ;;  %v1061_v42 = vmul.f32 %v2044_v18, %v1060_v15  ;;  %v2073_v45 = vld [vmem:[%s3149_s9 + $0xd8] sm:$0xff]  ;;  %v2074_v15 = vld [vmem:[%s3149_s9 + $0xd0] sm:$0xff] }
 0x57f   : > { %v1062_v52 = vadd.f32 %v2044_v18, %v1061_v42  ;;  %v2077_v42 = vld [vmem:[%s3149_s9 + $0xb8] sm:$0xff] }
 0x581   : > { %v1066_v25 = vsel %vm1065_vm5, %v2044_v18, %v1062_v52  ;;  %v2079_v52 = vld [vmem:[%s3149_s9 + $0xa8] sm:$0xff] }
 0x582   : > { %v1071_v34 = vsel %vm1068_vm6, %v1070_v7, %v1066_v25  ;;  %v2080_v7 = vld [vmem:[%s3149_s9 + $0xa0] sm:$0xff]  ;;  %v2081_v25 = vld [vmem:[%s3149_s9 + $0x98] sm:$0xff] }
 0x583   : > { %v1164_v31 = vadd.f32 1.0, %v1071_v34  ;;  %1183 = vperm.xlu2 %1980, %v1165_v44   ;;  %v2082_v44 = vld [vmem:[%s3149_s9 + $0x90] sm:$0xff]  ;;  %v2083_v34 = vld [vmem:[%s3149_s9 + $0x88] sm:$0xff] }
 0x585   : > { %1178 = vperm.xlu0 %1978, %v1164_v31   ;;  %1247 = vperm.xlu1 %1979, %v2893_v29   ;;  %v2084_v31 = vld [vmem:[%s3149_s9 + $0x80] sm:$0xff] }
 0x58b   : > { %1237 = vperm.xlu2 %1980, %v2899_v49  }
 0x58d   : > { %1242 = vperm.xlu0 %1978, %v2904_v32  }
 0x593   : > { %1252 = vperm.xlu2 %1980, %v2911_v33  }
 0x5cd   : > { %v1209_v37 = vpop.permute.xlu2 %1208 }
 0x5ce   : > { %v1225_v24 = vmul.f32 %v2053_v1, %v1209_v37  ;;  %v1226_v57 = vmul.f32 %v2054_v38, %v1209_v37 }
 0x5d0   : > { %1275 = vmatpush.msrb.mxu2 %v1225_v24  ;;  %1304 = vmatpush.msrb.mxu0 %v1226_v57 }
 0x5d5   : > { %v1199_v46 = vpop.permute.xlu1 %1198  ;;  %v1194_v21 = vpop.permute.xlu2 %1193 }
 0x5d6   : > { %v1221_v54 = vmul.f32 %v2057_v43, %v1199_v46  ;;  %v1222_v4 = vmul.f32 %v2058_v27, %v1199_v46  ;;  %v1219_v48 = vmul.f32 %v2059_v39, %v1194_v21  ;;  %v1220_v9 = vmul.f32 %v2060_v8, %v1194_v21 }
 0x5dd   : > { %v1204_v35 = vpop.permute.xlu0 %1203  ;;  %v1184_v10 = vpop.permute.xlu2 %1183 }
 0x5de   : > { %v1223_v41 = vmul.f32 %v2055_v40, %v1204_v35  ;;  %v1224_v2 = vmul.f32 %v2056_v0, %v1204_v35  ;;  %v1215_v16 = vmul.f32 %v2063_v26, %v1184_v10  ;;  %v1216_v6 = vmul.f32 %v2064_v62, %v1184_v10 }
 0x5e0   : > { %1276 = vmatpush.msrb.mxu2 %v1223_v41  ;;  %1305 = vmatpush.msrb.mxu0 %v1224_v2 }
 0x5e2   : > { %1277 = vmatpush.msrb.mxu2 %v1221_v54  ;;  %1306 = vmatpush.msrb.mxu0 %v1222_v4 }
 0x5e4   : > { %1278 = vmatpush.msrb.mxu2 %v1219_v48  ;;  %1307 = vmatpush.msrb.mxu0 %v1220_v9 }
 0x5e5   : > { %v1238_v37 = vpop.permute.xlu2 %1237 }
 0x5e7   : > { %v1189_v28 = vpop.permute.xlu1 %1188 }
 0x5e8   : > { %v1217_v13 = vmul.f32 %v2061_v20, %v1189_v28  ;;  %v1218_v22 = vmul.f32 %v2062_v50, %v1189_v28 }
 0x5ea   : > { %1279 = vmatpush.msrb.mxu2 %v1217_v13  ;;  %1308 = vmatpush.msrb.mxu0 %v1218_v22 }
 0x5ec   : > { %1280 = vmatpush.msrb.mxu2 %v1215_v16  ;;  %1309 = vmatpush.msrb.mxu0 %v1216_v6 }
 0x5ed   : > { %v1253_v10 = vpop.permute.xlu2 %1252 }
 0x5ef   : > { %v1174_v55 = vpop.permute.xlu1 %1173 }
 0x5f0   : > { %v1211_v18 = vmul.f32 %v2067_v63, %v1174_v55  ;;  %v1212_v5 = vmul.f32 %v2068_v3, %v1174_v55 }
 0x5f7   : > { %v1179_v51 = vpop.permute.xlu0 %1178  ;;  %v1248_v54 = vpop.permute.xlu1 %1247 }
 0x5f8   : > { %v1213_v14 = vmul.f32 %v2065_v47, %v1179_v51  ;;  %v1214_v60 = vmul.f32 %v2066_v58, %v1179_v51 }
 0x5fa   : > { %1281 = vmatpush.msrb.mxu2 %v1213_v14  ;;  %1310 = vmatpush.msrb.mxu0 %v1214_v60 }
 0x5fc   : > { %1282 = vmatpush.msrb.mxu2 %v1211_v18  ;;  %1311 = vmatpush.msrb.mxu0 %v1212_v5 }
 0x5fd   : > { %1866 = vmatmul.msk.f32.vlgmr.msrb.gmra.mxu2 %vm521_vm0, %v1231_v11  ;;  %1870 = vmatmul.msk.f32.vlgmr.msrb.gmra.mxu0 %vm521_vm0, %v1231_v11 }
 0x5fe   : > { %1354 = vmatpush.msra.mxu2 %v2069_v12  ;;  %1420 = vmatpush.msra.mxu0 %v2069_v12 }
 0x5ff   : > { %v1243_v21 = vpop.permute.xlu0 %1242 }
 0x600   : > { %1355 = vmatpush.msra.mxu2 %v2070_v17  ;;  %1421 = vmatpush.msra.mxu0 %v2070_v17 }
 0x602   : > { %1356 = vmatpush.msra.mxu2 %v2071_v56  ;;  %1422 = vmatpush.msra.mxu0 %v2071_v56 }
 0x604   : > { %1357 = vmatpush.msra.mxu2 %v2072_v36  ;;  %1423 = vmatpush.msra.mxu0 %v2072_v36 }
 0x605   : > { %1867 = vmatmul.msk.f32.gmra.mxu2 %vm521_vm0, %v1232_v30  ;;  %1871 = vmatmul.msk.f32.gmra.mxu0 %vm521_vm0, %v1232_v30 }
 0x606   : > { %1358 = vmatpush.msra.mxu2 %v2073_v45  ;;  %1424 = vmatpush.msra.mxu0 %v2073_v45 }
 0x608   : > { %1359 = vmatpush.msra.mxu2 %v2074_v15  ;;  %1425 = vmatpush.msra.mxu0 %v2074_v15 }
 0x60a   : > { %1360 = vmatpush.msra.mxu2 %v2075_v61  ;;  %1426 = vmatpush.msra.mxu0 %v2075_v61 }
 0x60c   : > { %1361 = vmatpush.msra.mxu2 %v2076_v53  ;;  %1427 = vmatpush.msra.mxu0 %v2076_v53 }
 0x60d   : > { %1868 = vmatmul.msk.f32.gmra.mxu2 %vm521_vm0, %v1233_v19  ;;  %1872 = vmatmul.msk.f32.gmra.mxu0 %vm521_vm0, %v1233_v19 }
 0x60e   : > { %1362 = vmatpush.msra.mxu2 %v2077_v42  ;;  %1428 = vmatpush.msra.mxu0 %v2077_v42 }
 0x610   : > { %1363 = vmatpush.msra.mxu2 %v2078_v23  ;;  %1429 = vmatpush.msra.mxu0 %v2078_v23 }
 0x612   : > { %1364 = vmatpush.msra.mxu2 %v2079_v52  ;;  %1430 = vmatpush.msra.mxu0 %v2079_v52 }
 0x614   : > { %1365 = vmatpush.msra.mxu2 %v2080_v7  ;;  %1431 = vmatpush.msra.mxu0 %v2080_v7 }
 0x615   : > { %1869 = vmatmul.msk.f32.gmra.mxu2 %vm521_vm0, %v1234_v59  ;;  %1873 = vmatmul.msk.f32.gmra.mxu0 %vm521_vm0, %v1234_v59 }
 0x616   : > { %1366 = vmatpush.msra.mxu2 %v2081_v25  ;;  %1432 = vmatpush.msra.mxu0 %v2081_v25 }
 0x618   : > { %1367 = vmatpush.msra.mxu2 %v2082_v44  ;;  %1433 = vmatpush.msra.mxu0 %v2082_v44 }
 0x61a   : > { %1368 = vmatpush.msra.mxu2 %v2083_v34  ;;  %1434 = vmatpush.msra.mxu0 %v2083_v34 }
 0x61c   : > { %1369 = vmatpush.msra.mxu2 %v2084_v31  ;;  %1435 = vmatpush.msra.mxu0 %v2084_v31 }
 0x67a   : > { %v1313_v1 = vpop.f32.mrf.mxu0 }
 0x67b   : > { %v2998_v24 = vadd.f32 %v1313_v1, %v1238_v37 }
 0x67d   : > { %v1384_v38 = vmul.f32 %v2998_v24, %v2998_v24  ;;  %1370 = vmatmul.f32.vlgmr.msra.gmra.mxu2 %v2998_v24 }
 0x67f   : > { %1436 = vmatmul.f32.vlgmr.msra.gmra.mxu0 %v1384_v38 }
 0x680   : > { %v1284_v57 = vpop.f32.mrf.mxu2 }
 0x681   : > { %v3003_v46 = vadd.f32 %v1284_v57, %v1238_v37  ;;  %v1449_v57 = vld [vmem:[#allocation2] sm:$0xff] }
 0x682   : > { %v1316_v35 = vpop.f32.mrf.mxu0 }
 0x683   : > { %v1383_v40 = vmul.f32 %v3003_v46, %v3003_v46  ;;  %v3007_v41 = vadd.f32 %v1316_v35, %v1243_v21  ;;  %1341 = vmatmul.f32.vlgmr.msrb.gmra.mxu1 %v3003_v46  ;;  %v1450_v35 = vld [vmem:[#allocation2 + $0x8] sm:$0xff] }
 0x685   : > { %1373 = vmatmul.f32.gmra.mxu2 %v3007_v41  ;;  %1407 = vmatmul.f32.vlgmr.msrb.gmra.mxu3 %v1383_v40  ;;  %v1386_v0 = vmul.f32 %v3007_v41, %v3007_v41  ;;  %v1451_v40 = vld [vmem:[#allocation2 + $0x10] sm:$0xff] }
 0x687   : > { %1439 = vmatmul.f32.gmra.mxu0 %v1386_v0  ;;  %v1452_v0 = vld [vmem:[#allocation2 + $0x18] sm:$0xff] }
 0x688   : > { %v1287_v2 = vpop.f32.mrf.mxu2 }
 0x689   : > { %v3013_v43 = vadd.f32 %v1287_v2, %v1243_v21 }
 0x68a   : > { %v1319_v27 = vpop.f32.mrf.mxu0 }
 0x68b   : > { %v3015_v4 = vadd.f32 %v1319_v27, %v1248_v54  ;;  %1344 = vmatmul.f32.gmra.mxu1 %v3013_v43  ;;  %v1385_v39 = vmul.f32 %v3013_v43, %v3013_v43 }
 0x68d   : > { %1376 = vmatmul.f32.gmra.mxu2 %v3015_v4  ;;  %1410 = vmatmul.f32.gmra.mxu3 %v1385_v39  ;;  %v1388_v48 = vmul.f32 %v3015_v4, %v3015_v4 }
 0x68f   : > { %1442 = vmatmul.f32.gmra.mxu0 %v1388_v48 }
 0x690   : > { %v1290_v8 = vpop.f32.mrf.mxu2 }
 0x691   : > { %v3023_v9 = vadd.f32 %v1290_v8, %v1248_v54 }
 0x692   : > { %v1322_v28 = vpop.f32.mrf.mxu0 }
 0x693   : > { %v3025_v20 = vadd.f32 %v1322_v28, %v1253_v10  ;;  %1347 = vmatmul.f32.gmra.mxu1 %v3023_v9  ;;  %v1387_v13 = vmul.f32 %v3023_v9, %v3023_v9 }
 0x695   : > { %1379 = vmatmul.f32.gmra.mxu2 %v3025_v20  ;;  %1413 = vmatmul.f32.gmra.mxu3 %v1387_v13  ;;  %v1390_v50 = vmul.f32 %v3025_v20, %v3025_v20 }
 0x697   : > { %1445 = vmatmul.f32.gmra.mxu0 %v1390_v50 }
 0x698   : > { %v1293_v22 = vpop.f32.mrf.mxu2 }
 0x699   : > { %v3033_v26 = vadd.f32 %v1293_v22, %v1253_v10 }
 0x69b   : > { %1350 = vmatmul.f32.gmra.mxu1 %v3033_v26  ;;  %v1389_v16 = vmul.f32 %v3033_v26, %v3033_v26 }
 0x69d   : > { %1416 = vmatmul.f32.gmra.mxu3 %v1389_v16 }
 0x6fc   : > { %v1437_v62 = vpop.f32.mrf.mxu0 }
 0x700   : > { %v1342_v17 = vpop.f32.mrf.mxu1  ;;  %v1371_v30 = vpop.f32.mrf.mxu2 }
 0x701   : > { %v1372_v1 = vadd.f32 %v1371_v30, %v1342_v17  ;;  %v1544_v17 = vld [vmem:[%s3147_s7 + $0x10] sm:$0xff]  ;;  %v1545_v30 = vld [vmem:[%s3147_s7 + $0x18] sm:$0xff] }
 0x704   : > { %v1440_v55 = vpop.f32.mrf.mxu0 }
 0x708   : > { %v1408_v6 = vpop.f32.mrf.mxu3  ;;  %v1345_v56 = vpop.f32.mrf.mxu1 }
 0x709   : > { %v1438_v47 = vadd.f32 %v1437_v62, %v1408_v6  ;;  %v1374_v36 = vpop.f32.mrf.mxu2 }
 0x70a   : > { %v1375_v34 = vadd.f32 %v1374_v36, %v1345_v56 }
 0x70c   : > { %v1443_v60 = vpop.f32.mrf.mxu0 }
 0x710   : > { %v1411_v51 = vpop.f32.mrf.mxu3  ;;  %v1348_v45 = vpop.f32.mrf.mxu1 }
 0x711   : > { %v1441_v14 = vadd.f32 %v1440_v55, %v1411_v51  ;;  %v1377_v15 = vpop.f32.mrf.mxu2 }
 0x712   : > { %v1378_v7 = vadd.f32 %v1377_v15, %v1348_v45 }
 0x713   : > { %v1986_v58 = vpack.i.bf16 %v1438_v47, %v1441_v14 }
 0x714   : > { %v1446_v18 = vpop.f32.mrf.mxu0 }
 0x715   : > { %1987 = vrot.lane.b32.xlu1 %v1986_v58, %s2186_s30 }
 0x718   : > { %v1414_v63 = vpop.f32.mrf.mxu3  ;;  %v1351_v19 = vpop.f32.mrf.mxu1 }
 0x719   : > { %v1444_v5 = vadd.f32 %v1443_v60, %v1414_v63  ;;  %v1380_v61 = vpop.f32.mrf.mxu2 }
 0x71a   : > { %v1381_v23 = vadd.f32 %v1380_v61, %v1351_v19 }
 0x720   : > { %v1417_v3 = vpop.f32.mrf.mxu3 }
 0x721   : > { %v1447_v11 = vadd.f32 %v1446_v18, %v1417_v3 }
 0x723   : > { %v1981_v12 = vpack.i.bf16 %v1444_v5, %v1447_v11  ;;  %v1542_v5 = vld [vmem:[%s3147_s7] sm:$0xff] }
 0x725   : > { %1982 = vrot.lane.b32.xlu0 %v1981_v12, %s2186_s30  ;;  %v1543_v12 = vld [vmem:[%s3147_s7 + $0x8] sm:$0xff] }
 0x787   : > { %v1988_v53 = vpop.permute.xlu1 %1987 }
 0x788   : > { %v1989_v25 = vunpack.i.l.bf16 %v1988_v53  ;;  %v1990_v31 = vunpack.i.h.bf16 %v1988_v53 }
 0x78a   : > { %v1470_v38 = vsel %vm627_vm1, %v1375_v34, %v1989_v25  ;;  %v1469_v21 = vsel %vm627_vm1, %v1372_v1, %v1990_v31 }
 0x797   : > { %v1983_v42 = vpop.permute.xlu0 %1982 }
 0x798   : > { %v1985_v59 = vunpack.i.h.bf16 %v1983_v42  ;;  %v1984_v52 = vunpack.i.l.bf16 %v1983_v42 }
 0x79a   : > { %v1472_v44 = vsel %vm627_vm1, %v1381_v23, %v1984_v52  ;;  %v1471_v37 = vsel %vm627_vm1, %v1378_v7, %v1985_v59 }
 0x79b   : > { %1497 = vmatpush.msra.mxu1 %v1472_v44 }
 0x79d   : > { %1498 = vmatpush.msra.mxu1 %v1471_v37 }
 0x79f   : > { %1499 = vmatpush.msra.mxu1 %v1470_v38 }
 0x7a1   : > { %1500 = vmatpush.msra.mxu1 %v1469_v21 }
 0x7a2   : > { %1874 = vmatmul.msk.f32.vlgmr.msra.gmra.mxu1 %vm721_vm2, %v1449_v57 }
 0x7aa   : > { %1875 = vmatmul.msk.f32.gmra.mxu1 %vm721_vm2, %v1450_v35 }
 0x7b2   : > { %1876 = vmatmul.msk.f32.gmra.mxu1 %vm721_vm2, %v1451_v40 }
 0x7ba   : > { %1877 = vmatmul.msk.f32.gmra.mxu1 %vm721_vm2, %v1452_v0 }
 0x81f   : > { %v1502_v2 = vpop.f32.mrf.mxu1 }
 0x820   : > { %v1514_v28 = vmul.f32 %v1502_v2, %v1502_v2 }
 0x827   : > { %v1505_v54 = vpop.f32.mrf.mxu1 }
 0x828   : > { %v1515_v27 = vmul.f32 %v1505_v54, %v1505_v54 }
 0x82a   : > { %1524 = vrot.lane.b32.xlu1 %v1515_v27, %s2186_s30 }
 0x82f   : > { %v1508_v39 = vpop.f32.mrf.mxu1 }
 0x830   : > { %v1516_v48 = vmul.f32 %v1508_v39, %v1508_v39 }
 0x832   : > { %1526 = vrot.lane.b32.xlu0 %v1516_v48, %s2186_s30 }
 0x837   : > { %v1511_v8 = vpop.f32.mrf.mxu1 }
 0x838   : > { %v1517_v10 = vmul.f32 %v1511_v8, %v1511_v8 }
 0x83a   : > { %1528 = vrot.lane.b32.xlu2 %v1517_v10, %s2186_s30 }
 0x842   : > { %1522 = vrot.lane.b32.xlu2 %v1514_v28, %s2186_s30  ;;  %s1888_s30 = sshll.u32 %s2271_s17, 6 }
 0x843   : > { %s1751_s20 = scalar_lea.hbm %s3150_s10, %s1888_s30 }
 0x844   : > { %s1754_s25 = sshll.u32 %s1751_s20, 4  ;;  %s1755_s25 = int_to_ptr.hbm [resolvable:$true] %s1754_s25 }
 0x845   : > { %s2129_s28 = sshra.s32 %s1755_s25, 4  ;;  %s2130_s28 = int_to_ptr.hbm [resolvable:$true] %s2129_s28 }
 0x846   : > { %s2131_s11 = scalar_lea.hbm %s2130_s28, 64  ;;  %p2136_p3 = scmp.lt.s32.totalorder %s2130_s28, %s3150_s10 }
 0x847   : > { %p2132_p0 = scmp.ne.s32.totalorder %s2130_s28, %s2131_s11  ;;  %p2137_p4 = scmp.lt.s32.totalorder %s2135_s29, %s2131_s11 }
 0x849   : > { %p2133_p1 = pnand %p2132_p0, %p2288_p5  ;;  %p2138_p7 = por %p2137_p4, %p2136_p3 }
 0x84b   : > { %p2134_p2 = pneg %p2133_p1 }
 0x84d   : > { %p2139_p8 = pnand %p2138_p7, %p2134_p2 }
 0x894   : > { %v1529_v13 = vpop.permute.xlu2 %1528 }
 0x895   : > { %v1537_v50 = vsub.f32 %v1511_v8, %v1529_v13 }
 0x897   : > { %v1541_v22 = vmax.f32 %v1537_v50, 0.0 }
 0x899   : > { %v1549_v16 = vsel %vm627_vm1, %v1511_v8, %v1541_v22 }
 0x89a   : > { %1574 = vmatpush.msrb.mxu2 %v1549_v16 }
 0x89c   : > { %v1525_v62 = vpop.permute.xlu1 %1524  ;;  %v1523_v6 = vpop.permute.xlu2 %1522 }
 0x89d   : > { %v1535_v55 = vsub.f32 %v1505_v54, %v1525_v62  ;;  %v1534_v47 = vsub.f32 %v1502_v2, %v1523_v6 }
 0x89f   : > { %v1539_v58 = vmax.f32 %v1535_v55, 0.0  ;;  %v1538_v63 = vmax.f32 %v1534_v47, 0.0  ;;  %v2191_v47 = vmov 1  }
 0x8a0   : > { %1992 = vset.pattern.permute.xlu0 %v2191_v47  ;;  %1991 = vset.pattern.permute.xlu2 %v2191_v47 }
 0x8a1   : > { %v1547_v3 = vsel %vm627_vm1, %v1505_v54, %v1539_v58  ;;  %v1546_v11 = vsel %vm627_vm1, %v1502_v2, %v1538_v63  ;;  %1993 = vset.pattern.permute.xlu1 %v2191_v47 }
 0x8a4   : > { %v1527_v51 = vpop.permute.xlu0 %1526 }
 0x8a5   : > { %v1536_v14 = vsub.f32 %v1508_v39, %v1527_v51 }
 0x8a7   : > { %v1540_v60 = vmax.f32 %v1536_v14, 0.0 }
 0x8a9   : > { %v1548_v18 = vsel %vm627_vm1, %v1508_v39, %v1540_v60 }
 0x8aa   : > { %1575 = vmatpush.msrb.mxu2 %v1548_v18 }
 0x8ac   : > { %1576 = vmatpush.msrb.mxu2 %v1547_v3 }
 0x8ae   : > { %1577 = vmatpush.msrb.mxu2 %v1546_v11 }
 0x8af   : > { %1878 = vmatmul.msk.f32.vlgmr.msrb.gmra.mxu2 %vm721_vm2, %v1542_v5 }
 0x8b7   : > { %1879 = vmatmul.msk.f32.gmra.mxu2 %vm721_vm2, %v1543_v12  ;;  %v2192_v12 = vmov 2  }
 0x8bf   : > { %1880 = vmatmul.msk.f32.gmra.mxu2 %vm721_vm2, %v1544_v17 }
 0x8c7   : > { %1881 = vmatmul.msk.f32.gmra.mxu2 %vm721_vm2, %v1545_v30 }
 0x932   : > { %v3072_v56 = vpop.f32.mrf.mxu2 }
 0x933   : > { %v1591_v36 = vadd.f32 1e-05, %v3072_v56 }
 0x935   : > { %2045 = vrsqrt.f32 %v1591_v36  ;;  %vm1601_vm1 = vweird.f32 %v1591_v36 }
 0x93a   : > { %v3075_v45 = vpop.f32.mrf.mxu2 }
 0x93b   : > { %v2046_v15 = vpop.eup %2045  ;;  %v1592_v19 = vadd.f32 1e-05, %v3075_v45 }
 0x93c   : > { %v1596_v61 = vmul.f32 %v2046_v15, %v1591_v36  ;;  %vm1602_vm0 = vweird.f32 %v2046_v15 }
 0x93d   : > { %2047 = vrsqrt.f32 %v1592_v19  ;;  %vm1603_vm2 = vmor %vm1601_vm1, %vm1602_vm0  ;;  %vm1611_vm8 = vweird.f32 %v1592_v19 }
 0x93e   : > { %v1597_v53 = vmul.f32 %v2046_v15, %v1596_v61 }
 0x940   : > { %v1598_v42 = vmul.f32 0.5, %v1597_v53 }
 0x942   : > { %v1599_v23 = vsub.f32 1.5, %v1598_v42  ;;  %v1585_v59 = vpop.f32.mrf.mxu2 }
 0x943   : > { %v2048_v52 = vpop.eup %2047  ;;  %v1593_v7 = vadd.f32 1e-05, %v1585_v59 }
 0x944   : > { %v1606_v25 = vmul.f32 %v2048_v52, %v1592_v19  ;;  %v1600_v44 = vmul.f32 %v2046_v15, %v1599_v23  ;;  %vm1612_vm7 = vweird.f32 %v2048_v52 }
 0x945   : > { %2049 = vrsqrt.f32 %v1593_v7  ;;  %vm1613_vm9 = vmor %vm1611_vm8, %vm1612_vm7  ;;  %vm1621_vm11 = vweird.f32 %v1593_v7 }
 0x946   : > { %v1607_v34 = vmul.f32 %v2048_v52, %v1606_v25  ;;  %v1604_v31 = vsel %vm1603_vm2, %v2046_v15, %v1600_v44 }
 0x947   : > { %v1635_v37 = vmul.f32 %v1604_v31, %v2899_v49 }
 0x948   : > { %v1608_v1 = vmul.f32 0.5, %v1607_v34 }
 0x949   : > { %1643 = vrot.lane.b32.xlu0 %v1635_v37, %s2187_s26 }
 0x94a   : > { %v1609_v38 = vsub.f32 1.5, %v1608_v1  ;;  %v1588_v57 = vpop.f32.mrf.mxu2 }
 0x94b   : > { %v2050_v21 = vpop.eup %2049  ;;  %v1594_v35 = vadd.f32 1e-05, %v1588_v57 }
 0x94c   : > { %v1616_v40 = vmul.f32 %v2050_v21, %v1593_v7  ;;  %v1610_v0 = vmul.f32 %v2048_v52, %v1609_v38  ;;  %vm1622_vm10 = vweird.f32 %v2050_v21 }
 0x94d   : > { %2051 = vrsqrt.f32 %v1594_v35  ;;  %vm1623_vm12 = vmor %vm1621_vm11, %vm1622_vm10  ;;  %vm1631_vm14 = vweird.f32 %v1594_v35 }
 0x94e   : > { %v1617_v2 = vmul.f32 %v2050_v21, %v1616_v40  ;;  %v1614_v54 = vsel %vm1613_vm9, %v2048_v52, %v1610_v0 }
 0x94f   : > { %v1636_v27 = vmul.f32 %v1614_v54, %v2904_v32 }
 0x950   : > { %v1618_v39 = vmul.f32 0.5, %v1617_v2 }
 0x951   : > { %1645 = vrot.lane.b32.xlu1 %v1636_v27, %s2187_s26 }
 0x952   : > { %v1619_v48 = vsub.f32 1.5, %v1618_v39 }
 0x953   : > { %v2052_v8 = vpop.eup %2051 }
 0x954   : > { %v1626_v10 = vmul.f32 %v2052_v8, %v1594_v35  ;;  %v1620_v28 = vmul.f32 %v2050_v21, %v1619_v48  ;;  %vm1632_vm13 = vweird.f32 %v2052_v8 }
 0x955   : > { %vm1633_vm15 = vmor %vm1631_vm14, %vm1632_vm13 }
 0x956   : > { %v1627_v13 = vmul.f32 %v2052_v8, %v1626_v10  ;;  %v1624_v50 = vsel %vm1623_vm12, %v2050_v21, %v1620_v28 }
 0x957   : > { %v1637_v22 = vmul.f32 %v1624_v50, %v2893_v29 }
 0x958   : > { %v1628_v16 = vmul.f32 0.5, %v1627_v13 }
 0x959   : > { %1647 = vrot.lane.b32.xlu2 %v1637_v22, %s2187_s26 }
 0x95a   : > { %v1629_v62 = vsub.f32 1.5, %v1628_v16 }
 0x95c   : > { %v1630_v6 = vmul.f32 %v2052_v8, %v1629_v62 }
 0x95e   : > { %v1634_v55 = vsel %vm1633_vm15, %v2052_v8, %v1630_v6 }
 0x95f   : > { %v1638_v51 = vmul.f32 %v1634_v55, %v2911_v33 }
 0x961   : > { %1649 = vrot.lane.b32.xlu0 %v1638_v51, %s2187_s26  ;;  %s367_s26 = sand.u32 1, %s2173_s14  }
 0x962   : > { %s1740_s17 = scalar_lea.sflag [#allocation4], %s367_s26 }
 0x9b3   : > { %v1648_v14 = vpop.permute.xlu2 %1647 }
 0x9b4   : > { %v1657_v58 = vmul.f32 %v1648_v14, %v1585_v59 }
 0x9b6   : > { %1667 = vrot.lane.b32.xlu0 %v1657_v58, %s2188_s27 }
 0x9bb   : > { %v1644_v60 = vpop.permute.xlu0 %1643 }
 0x9bc   : > { %v1655_v63 = vmul.f32 %v1644_v60, %v3072_v56 }
 0x9be   : > { %1663 = vrot.lane.b32.xlu1 %v1655_v63, %s2188_s27  ;;  %1684 = vperm.xlu0 %1992, %v1636_v27  }
 0x9c3   : > { %v1646_v18 = vpop.permute.xlu1 %1645 }
 0x9c4   : > { %v1656_v3 = vmul.f32 %v1646_v18, %v3075_v45 }
 0x9c6   : > { %1665 = vrot.lane.b32.xlu2 %v1656_v3, %s2188_s27  ;;  %1996 = vset.pattern.permute.xlu0 %v2192_v12 }
 0x9ce   : > { %1680 = vperm.xlu2 %1991, %v1635_v37  }
 0x9d3   : > { %v1650_v5 = vpop.permute.xlu0 %1649 }
 0x9d4   : > { %v1658_v11 = vmul.f32 %v1650_v5, %v1588_v57 }
 0x9d6   : > { %1692 = vperm.xlu2 %1991, %v1638_v51   ;;  %1669 = vrot.lane.b32.xlu1 %v1658_v11, %s2188_s27  ;;  %s1835_s27 = sshll.u32 %s367_s26, 6 }
 0x9d7   : > { %s369_s12 = scalar_lea.vmem [#allocation5], %s1835_s27 }
 0x9d8   : > { %s1752_s21 = sshll.u32 %s369_s12, 4  ;;  %s1753_s21 = int_to_ptr.vmem [resolvable:$true] %s1752_s21 }
 0x9de   : > { %1688 = vperm.xlu1 %1993, %v1637_v22   ;;  %1995 = vset.pattern.permute.xlu2 %v2192_v12 }
 0x9e6   : > { %1994 = vset.pattern.permute.xlu1 %v2192_v12 }
 0xa20   : > { %v1666_v17 = vpop.permute.xlu2 %1665 }
 0xa21   : > { %v1676_v30 = vsub.f32 %v2904_v32, %v1666_v17 }
 0xa23   : > { %1710 = vperm.xlu2 %1995, %v1676_v30  }
 0xa28   : > { %v1668_v56 = vpop.permute.xlu0 %1667  ;;  %v1681_v53 = vpop.permute.xlu2 %1680 }
 0xa29   : > { %v1677_v36 = vsub.f32 %v2893_v29, %v1668_v56 }
 0xa2b   : > { %1715 = vperm.xlu0 %1996, %v1677_v36  }
 0xa30   : > { %v1664_v45 = vpop.permute.xlu1 %1663  ;;  %v1693_v42 = vpop.permute.xlu2 %1692 }
 0xa31   : > { %v1675_v15 = vsub.f32 %v2899_v49, %v1664_v45  ;;  %v1685_v23 = vpop.permute.xlu0 %1684 }
 0xa32   : > { %v1697_v32 = vmul.f32 %v1685_v23, %v3013_v43  ;;  %v1698_v59 = vmul.f32 %v1685_v23, %v3007_v41  ;;  %v1695_v43 = vmul.f32 %v1681_v53, %v3003_v46  ;;  %v1696_v41 = vmul.f32 %v1681_v53, %v2998_v24 }
 0xa33   : > { %1705 = vperm.xlu1 %1994, %v1675_v15  }
 0xa48   : > { %v1670_v19 = vpop.permute.xlu1 %1669 }
 0xa49   : > { %v1678_v61 = vsub.f32 %v2911_v33, %v1670_v19 }
 0xa4b   : > { %1720 = vperm.xlu1 %1994, %v1678_v61  }
 0xa50   : > { %v1689_v49 = vpop.permute.xlu1 %1688 }
 0xa51   : > { %v1699_v33 = vmul.f32 %v1689_v49, %v3023_v9  ;;  %v1700_v25 = vmul.f32 %v1689_v49, %v3015_v4  ;;  %v1701_v4 = vmul.f32 %v1693_v42, %v3033_v26  ;;  %v1702_v9 = vmul.f32 %v1693_v42, %v3025_v20 }
 0xa7d   : > { %v1711_v29 = vpop.permute.xlu2 %1710 }
 0xa7e   : > { %v1725_v52 = vadd.f32 %v1711_v29, %v1697_v32  ;;  %v1726_v7 = vadd.f32 %v1711_v29, %v1698_v59 }
 0xa80   : > { %1733 = vst [vmem:[%s369_s12 + $0x10] sm:$0xff] %v1725_v52 }
 0xa81   : > { %1734 = vst [vmem:[%s369_s12 + $0x18] sm:$0xff] %v1726_v7 }
 0xa9d   : > { %v1716_v44 = vpop.permute.xlu0 %1715 }
 0xa9e   : > { %v1727_v34 = vadd.f32 %v1716_v44, %v1699_v33  ;;  %v1728_v31 = vadd.f32 %v1716_v44, %v1700_v25 }
 0xaa0   : > { %1735 = vst [vmem:[%s369_s12 + $0x20] sm:$0xff] %v1727_v34 }
 0xaa1   : > { %1736 = vst [vmem:[%s369_s12 + $0x28] sm:$0xff] %v1728_v31 }
 0xaa5   : > { %v1706_v37 = vpop.permute.xlu1 %1705 }
 0xaa6   : > { %v1723_v1 = vadd.f32 %v1706_v37, %v1695_v43  ;;  %v1724_v38 = vadd.f32 %v1706_v37, %v1696_v41 }
 0xaa8   : > { %1731 = vst [vmem:[%s369_s12] sm:$0xff] %v1723_v1 }
 0xaa9   : > { %1732 = vst [vmem:[%s369_s12 + $0x8] sm:$0xff] %v1724_v38 }
 0xabd   : > { %v1721_v46 = vpop.permute.xlu1 %1720 }
 0xabe   : > { %v1729_v24 = vadd.f32 %v1721_v46, %v1701_v4  ;;  %v1730_v57 = vadd.f32 %v1721_v46, %v1702_v9 }
 0xac0   : > { %1737 = vst [vmem:[%s369_s12 + $0x30] sm:$0xff] %v1729_v24 }
 0xac1   : > { %1738 = vst [vmem:[%s369_s12 + $0x38] sm:$0xff] %v1730_v57 }
 0xac2   : > { %2142 = shalt.err (!%p2139_p8)
}
 0xac3   : > { %s2193_s26 = smov 256   ;;  %s2194_s12 = smov 16  }
 0xac4   : > { %1901 = dma.vmem_to_hbm [thread:$0]  (%p2288_p5), %s1753_s21, 1024, %s1755_s25, %s1740_s17, %s2193_s26, %s2193_s26, %s2194_s12  }
 0xac5 PF: > { %p1913_p9 = scmp.ge.s32.totalorder %s2181_s16, 2  ;;  %s1769_s27 = sand.u32 1, %s2169_s13  }
 0xac6   : > { %s1770_s30 = scalar_lea.sflag [#allocation4], %s1769_s27 }
 0xac7   : > { %p1908_p10 = pnand %p1913_p9, %p2292_p6 }
 0xac9   : > { %p1909_p11 = pneg %p1908_p10 }
 0xacb   : > { %2164 = dma.done.wait (%p1909_p11), %s1770_s30, 1024  }
 0xacc   : > { %2166 = vsyncadd (%p1909_p11), %s1770_s30, 4294966272  ;;  %p21_p12 = scmp.ge.s32.totalorder %s2275_s19, 4   ;;  %s3155_s13 = smov %s2173_s14 }
 0xacd   : > { %s3156_s14 = smov %s2177_s15  ;;  %s3157_s15 = smov %s2286_s22 }
 0xace   : > { %s3158_s16 = smov %s2275_s19  ;;  %23 = sbr.rel (!%p21_p12) target bundleno = 4 (0x4), region = 100 }
 0xad3   :  { %1776 = vsyncpa [#allocation3], 1 }
 0xad4   :  { %1778 = vsyncpa [#allocation3 + $0x1], 1 }
 0xad5   :  { %1779 = vsyncpa [#allocation4], 1 }
 0xad6   :  { %1781 = vsyncpa [#allocation4 + $0x1], 1 }

</bundles_post_ra>
